<compile_context>
chip_gen: v5e
topology: v5e:2x2
jax: 0.10.0
libtpu: 0.0.40
codegen_flags: <defaults>
</compile_context>

<pallas_src>
import functools
import math

import numpy as np

import jax
import jax.numpy as jnp
from jax.experimental import pallas as pl
from jax.experimental.pallas import tpu as pltpu

blockSize = 8      # T (sequence length / causal mask size)
n_embed = 32       # C

_MASK_BIAS = -1e30  # finite "-inf": keeps 0 * bias finite inside routing matmuls


def _lane_roll(x, k):
    """Cyclic left-roll along the last (lane) axis: result[..., j] = x[..., (j+k) % n].

    Implemented as slice+concat (semantics unambiguous; Mosaic lowers it to
    lane shifts on the XLU).  Equivalent to jnp.roll(x, -k, axis=-1).
    """
    n = x.shape[-1]
    k = k % n
    if k == 0:
        return x
    return jnp.concatenate([x[..., k:], x[..., :k]], axis=-1)


def _head_kernel(x_ref, w_ref, s_ref, r_ref, bsel_ref, ones_ref, bias_ref,
                 o_ref, *, T, H):
    """One block of batch elements per grid step.

    x_ref    : (b_blk, T*C)     lane-dense input block
    w_ref    : (T*C, 3*T*H)     block-diagonal fused [Wq*sqrt(C) | Wk | Wv]
    s_ref    : (T*T*H, T*T)     0/1 routing: (d, t, h) products -> score col t*T+s
    r_ref    : (T*T, T*T*H)     0/1 routing: prob col t*T+s -> (d, t, h) slab
    bsel_ref : (T*T, T*T)       0/1 broadcast of lane t*T (group max) over its group
    ones_ref : (T*T, T*T)       block-diagonal TxT ones (segmented sum-broadcast)
    bias_ref : (1, T*T)         causal mask as additive bias (0 / -1e30)
    o_ref    : (b_blk, T*H)     lane-dense output block
    """
    TH = T * H

    x = x_ref[...].astype(jnp.float32)                      # (b_blk, T*C)
    w = w_ref[...].astype(jnp.float32)                      # (T*C, 3*TH)

    # ---- fused block-diagonal Q/K/V projection: one big MXU matmul ----------
    qkv = jnp.dot(x, w, preferred_element_type=jnp.float32)  # (b_blk, 3*TH)
    q = qkv[:, 0 * TH:1 * TH]     # (b_blk, TH)  sqrt(C) scale already folded in
    k = qkv[:, 1 * TH:2 * TH]
    v = qkv[:, 2 * TH:3 * TH]

    # ---- scores via the "diagonal" trick (VPU multiplies, no batched einsum) -
    # Rolling k left by d*H lanes aligns query group t with key group (t+d)%T:
    #   prods[d][b, t*H + h] = q[b, t, h] * k[b, (t+d)%T, h]
    prods = [q * _lane_roll(k, d * H) for d in range(T)]
    p = jnp.concatenate(prods, axis=-1)                       # (b_blk, T*TH)
    # Constant 0/1 matmul reduces over h and routes each (t, d) product group
    # into score column t*T + s (s = (t+d)%T):
    wei = jnp.dot(p, s_ref[...], preferred_element_type=jnp.float32)  # (b_blk, T*T)
    wei = wei + bias_ref[...]                                  # causal mask bias

    # ---- segmented softmax over each group of T lanes (lane-dense) ----------
    m = wei
    step = T // 2
    while step >= 1:                                           # 3-step roll tree
        m = jnp.maximum(m, _lane_roll(m, step))
        step //= 2
    # lane t*T now holds the max of group t; broadcast it across the group
    mx = jnp.dot(m, bsel_ref[...], preferred_element_type=jnp.float32)
    e = jnp.exp(wei - mx)                                      # masked -> exactly 0
    denom = jnp.dot(e, ones_ref[...], preferred_element_type=jnp.float32)
    probs = e / denom                                          # exact normalization

    # ---- AV contraction: route probs back to the diagonal layout, FMA with v -
    g = jnp.dot(probs, r_ref[...], preferred_element_type=jnp.float32)  # (b_blk, T*TH)
    out = g[:, 0:TH] * v
    for d in range(1, T):
        out = out + g[:, d * TH:(d + 1) * TH] * _lane_roll(v, d * H)

    # Output is already lane-dense (b_blk, T*H) -> unmasked 128-lane store.
    o_ref[...] = out.astype(o_ref.dtype)


def _build_constants(T, H, C, wq_t, wk_t, wv_t, scale):
    """Build the fused block-diagonal weight and the 0/1 routing constants."""
    TH, TT, TC = T * H, T * T, T * C

    def block_diag(w):  # (C, H) -> (T*C, T*H) with T copies of w on the diagonal
        eye = jnp.eye(T, dtype=jnp.float32)
        return jnp.einsum("tu,ch->tcuh", eye, w.astype(jnp.float32)).reshape(TC, TH)

    # Fold the reference's `* C**0.5` into the Q projection (review item 9).
    w_big = jnp.concatenate(
        [block_diag(wq_t * scale), block_diag(wk_t), block_diag(wv_t)], axis=1)

    s_mat = np.zeros((T * TH, TT), np.float32)
    for d in range(T):
        for t in range(T):
            s = (t + d) % T
            s_mat[d * TH + t * H: d * TH + (t + 1) * H, t * T + s] = 1.0
    r_mat = np.ascontiguousarray(s_mat.T)

    bsel = np.zeros((TT, TT), np.float32)
    ones_bd = np.zeros((TT, TT), np.float32)
    bias = np.zeros((1, TT), np.float32)
    for t in range(T):
        bsel[t * T, t * T:(t + 1) * T] = 1.0
        ones_bd[t * T:(t + 1) * T, t * T:(t + 1) * T] = 1.0
        for s in range(T):
            if s > t:
                bias[0, t * T + s] = _MASK_BIAS

    return (w_big, jnp.asarray(s_mat), jnp.asarray(r_mat),
            jnp.asarray(bsel), jnp.asarray(ones_bd), jnp.asarray(bias))


def head_forward(x, wq_t, wk_t, wv_t, *, b_blk=None):
    """x: (B, T, C) float32; w*_t: (C, H) float32 (transposed nn.Linear weights)."""
    B, T, C = x.shape
    H = wq_t.shape[1]
    assert T & (T - 1) == 0, "segmented softmax assumes T is a power of two"

    scale = C ** 0.5  # NOTE: reference multiplies by C**0.5 (as written in main.py)
    w_big, s_mat, r_mat, bsel, ones_bd, bias = _build_constants(
        T, H, C, wq_t, wk_t, wv_t, scale)

    TH, TT, TC = T * H, T * T, T * C

    # Lane-dense input (review item 1): free row-major reshape.
    x2 = x.reshape(B, TC)

    # Batch-block heuristic (review item 6): >= 2 blocks when B > 8 so the
    # "parallel" axis shards across v7x's two TensorCores; cap to keep VMEM
    # temporaries small on every generation.
    if b_blk is None:
        if B <= 8:
            b_blk = B
        else:
            half = (B + 1) // 2
            b_blk = min(256, ((half + 7) // 8) * 8)
    if b_blk < B and b_blk % 8 != 0:
        b_blk = ((b_blk + 7) // 8) * 8

    n_blocks = pl.cdiv(B, b_blk)
    B_pad = n_blocks * b_blk
    if B_pad != B:
        # Zero padding is safe: padded rows give finite (zero) outputs, discarded.
        x2 = jnp.pad(x2, ((0, B_pad - B), (0, 0)))

    kernel = functools.partial(_head_kernel, T=T, H=H)

    out_flat = pl.pallas_call(
        kernel,
        out_shape=jax.ShapeDtypeStruct((B_pad, TH), x.dtype),
        grid=(n_blocks,),
        in_specs=[
            pl.BlockSpec((b_blk, TC), lambda b: (b, 0)),       # x (lane-dense)
            pl.BlockSpec((TC, 3 * TH), lambda b: (0, 0)),      # fused weight
            pl.BlockSpec((T * TH, TT), lambda b: (0, 0)),      # score routing
            pl.BlockSpec((TT, T * TH), lambda b: (0, 0)),      # AV routing
            pl.BlockSpec((TT, TT), lambda b: (0, 0)),          # max broadcast
            pl.BlockSpec((TT, TT), lambda b: (0, 0)),          # sum broadcast
            pl.BlockSpec((1, TT), lambda b: (0, 0)),           # causal bias
        ],
        out_specs=pl.BlockSpec((b_blk, TH), lambda b: (b, 0)),
        compiler_params=pltpu.CompilerParams(
            dimension_semantics=("parallel",),
        ),
    )(x2, w_big, s_mat, r_mat, bsel, ones_bd, bias)

    return out_flat[:B].reshape(B, T, H)


def reference_forward(x, wq_t, wk_t, wv_t):
    """Pure-JAX reference mirroring the PyTorch forward."""
    B, T, C = x.shape
    q = x @ wq_t
    k = x @ wk_t
    v = x @ wv_t
    wei = jnp.einsum("bth,bsh->bts", q, k) * (C ** 0.5)
    tril = jnp.tril(jnp.ones((T, T), dtype=bool))
    wei = jnp.where(tril, wei, -jnp.inf)
    wei = jax.nn.softmax(wei, axis=-1)
    return wei @ v


if __name__ == "__main__":
    head_size = 16
    B, T, C = 2, blockSize, n_embed

    key = jax.random.PRNGKey(0)
    kx, kq, kk, kv = jax.random.split(key, 4)

    # nn.Linear default init: U(-1/sqrt(C), 1/sqrt(C)); we store W^T as (C, H).
    bound = 1.0 / math.sqrt(C)
    wq_t = jax.random.uniform(kq, (C, head_size), jnp.float32, -bound, bound)
    wk_t = jax.random.uniform(kk, (C, head_size), jnp.float32, -bound, bound)
    wv_t = jax.random.uniform(kv, (C, head_size), jnp.float32, -bound, bound)

    x = jax.random.normal(kx, (B, T, C), jnp.float32)

    out = jax.block_until_ready(head_forward(x, wq_t, wk_t, wv_t))
    ref = reference_forward(x, wq_t, wk_t, wv_t)
    assert out.shape == (B, T, head_size), out.shape
    # Tolerance sized for DEFAULT matmul precision on a real MXU (bf16 passes);
    # in interpret mode / highest precision the kernel matches to ~1e-6.
    diff = float(jnp.max(jnp.abs(out - ref)))
    assert jnp.allclose(out, ref, atol=2e-2, rtol=2e-2), f"max abs diff {diff}"
    assert bool(jnp.all(jnp.isfinite(out)))

    # Multi-block path: default heuristic (>=2 blocks) and an explicit block
    # size that forces padding (B % b_blk != 0).
    B2 = 20
    x2 = jax.random.normal(jax.random.PRNGKey(1), (B2, T, C), jnp.float32)
    ref2 = reference_forward(x2, wq_t, wk_t, wv_t)

    out2 = jax.block_until_ready(head_forward(x2, wq_t, wk_t, wv_t))
    assert out2.shape == (B2, T, head_size), out2.shape
    diff2 = float(jnp.max(jnp.abs(out2 - ref2)))
    assert jnp.allclose(out2, ref2, atol=2e-2, rtol=2e-2), f"max abs diff {diff2}"

    out3 = jax.block_until_ready(head_forward(x2, wq_t, wk_t, wv_t, b_blk=8))
    diff3 = float(jnp.max(jnp.abs(out3 - ref2)))
    assert jnp.allclose(out3, ref2, atol=2e-2, rtol=2e-2), f"max abs diff {diff3}"

    print("KERNEL_OK")
</pallas_src>

<mosaic_0001>
module attributes {stable_mosaic.version = 11 : i64} {
  func.func @_head_kernel(%arg0: i32, %arg1: memref<2x256xf32, #tpu.memory_space<vmem>>, %arg2: memref<256x384xf32, #tpu.memory_space<vmem>>, %arg3: memref<1024x64xf32, #tpu.memory_space<vmem>>, %arg4: memref<64x1024xf32, #tpu.memory_space<vmem>>, %arg5: memref<64x64xf32, #tpu.memory_space<vmem>>, %arg6: memref<64x64xf32, #tpu.memory_space<vmem>>, %arg7: memref<1x64xf32, #tpu.memory_space<vmem>>, %arg8: memref<2x128xf32, #tpu.memory_space<vmem>>) attributes {dimension_semantics = [#tpu.dimension_semantics<parallel>], iteration_bounds = array<i64: 1>, scalar_prefetch = 0 : i64, scratch_operands = 0 : i64, tpu.core_type = #tpu.core_type<tc>, window_params = [{transform_indices = @transform_0, window_bounds = array<i64: 2, 256>}, {pipeline_mode = #tpu.pipeline_mode<synchronous>, transform_indices = @transform_1, window_bounds = array<i64: 256, 384>}, {pipeline_mode = #tpu.pipeline_mode<synchronous>, transform_indices = @transform_2, window_bounds = array<i64: 1024, 64>}, {pipeline_mode = #tpu.pipeline_mode<synchronous>, transform_indices = @transform_3, window_bounds = array<i64: 64, 1024>}, {pipeline_mode = #tpu.pipeline_mode<synchronous>, transform_indices = @transform_4, window_bounds = array<i64: 64, 64>}, {pipeline_mode = #tpu.pipeline_mode<synchronous>, transform_indices = @transform_5, window_bounds = array<i64: 64, 64>}, {pipeline_mode = #tpu.pipeline_mode<synchronous>, transform_indices = @transform_6, window_bounds = array<i64: 1, 64>}, {transform_indices = @transform_7, window_bounds = array<i64: 2, 128>}]} {
    %c0 = arith.constant 0 : index
    %c0_0 = arith.constant 0 : index
    %0 = vector.load %arg1[%c0, %c0_0] : memref<2x256xf32, #tpu.memory_space<vmem>>, vector<2x256xf32>
    %c0_1 = arith.constant 0 : index
    %c0_2 = arith.constant 0 : index
    %1 = vector.load %arg2[%c0_1, %c0_2] : memref<256x384xf32, #tpu.memory_space<vmem>>, vector<256x384xf32>
    %cst = arith.constant dense<0.000000e+00> : vector<2x384xf32>
    %2 = tpu.matmul %0, %1, %cst {dimension_numbers = #tpu.dot_dimension_numbers<[1], [0], [0], [1], [0, 0, 1, 1], [], []>} : vector<2x256xf32>, vector<256x384xf32>, vector<2x384xf32> -> vector<2x384xf32>
    %3 = vector.extract_strided_slice %2 {offsets = [0, 0], sizes = [2, 128], strides = [1, 1]} : vector<2x384xf32> to vector<2x128xf32>
    %4 = vector.extract_strided_slice %2 {offsets = [0, 128], sizes = [2, 128], strides = [1, 1]} : vector<2x384xf32> to vector<2x128xf32>
    %5 = vector.extract_strided_slice %2 {offsets = [0, 256], sizes = [2, 128], strides = [1, 1]} : vector<2x384xf32> to vector<2x128xf32>
    %6 = arith.mulf %3, %4 : vector<2x128xf32>
    %7 = vector.extract_strided_slice %4 {offsets = [0, 16], sizes = [2, 112], strides = [1, 1]} : vector<2x128xf32> to vector<2x112xf32>
    %8 = vector.extract_strided_slice %4 {offsets = [0, 0], sizes = [2, 16], strides = [1, 1]} : vector<2x128xf32> to vector<2x16xf32>
    %9 = tpu.concatenate %7, %8 in 1 : vector<2x112xf32>, vector<2x16xf32> -> vector<2x128xf32>
    %10 = arith.mulf %3, %9 : vector<2x128xf32>
    %11 = vector.extract_strided_slice %4 {offsets = [0, 32], sizes = [2, 96], strides = [1, 1]} : vector<2x128xf32> to vector<2x96xf32>
    %12 = vector.extract_strided_slice %4 {offsets = [0, 0], sizes = [2, 32], strides = [1, 1]} : vector<2x128xf32> to vector<2x32xf32>
    %13 = tpu.concatenate %11, %12 in 1 : vector<2x96xf32>, vector<2x32xf32> -> vector<2x128xf32>
    %14 = arith.mulf %3, %13 : vector<2x128xf32>
    %15 = vector.extract_strided_slice %4 {offsets = [0, 48], sizes = [2, 80], strides = [1, 1]} : vector<2x128xf32> to vector<2x80xf32>
    %16 = vector.extract_strided_slice %4 {offsets = [0, 0], sizes = [2, 48], strides = [1, 1]} : vector<2x128xf32> to vector<2x48xf32>
    %17 = tpu.concatenate %15, %16 in 1 : vector<2x80xf32>, vector<2x48xf32> -> vector<2x128xf32>
    %18 = arith.mulf %3, %17 : vector<2x128xf32>
    %19 = vector.extract_strided_slice %4 {offsets = [0, 64], sizes = [2, 64], strides = [1, 1]} : vector<2x128xf32> to vector<2x64xf32>
    %20 = vector.extract_strided_slice %4 {offsets = [0, 0], sizes = [2, 64], strides = [1, 1]} : vector<2x128xf32> to vector<2x64xf32>
    %21 = tpu.concatenate %19, %20 in 1 : vector<2x64xf32>, vector<2x64xf32> -> vector<2x128xf32>
    %22 = arith.mulf %3, %21 : vector<2x128xf32>
    %23 = vector.extract_strided_slice %4 {offsets = [0, 80], sizes = [2, 48], strides = [1, 1]} : vector<2x128xf32> to vector<2x48xf32>
    %24 = vector.extract_strided_slice %4 {offsets = [0, 0], sizes = [2, 80], strides = [1, 1]} : vector<2x128xf32> to vector<2x80xf32>
    %25 = tpu.concatenate %23, %24 in 1 : vector<2x48xf32>, vector<2x80xf32> -> vector<2x128xf32>
    %26 = arith.mulf %3, %25 : vector<2x128xf32>
    %27 = vector.extract_strided_slice %4 {offsets = [0, 96], sizes = [2, 32], strides = [1, 1]} : vector<2x128xf32> to vector<2x32xf32>
    %28 = vector.extract_strided_slice %4 {offsets = [0, 0], sizes = [2, 96], strides = [1, 1]} : vector<2x128xf32> to vector<2x96xf32>
    %29 = tpu.concatenate %27, %28 in 1 : vector<2x32xf32>, vector<2x96xf32> -> vector<2x128xf32>
    %30 = arith.mulf %3, %29 : vector<2x128xf32>
    %31 = vector.extract_strided_slice %4 {offsets = [0, 112], sizes = [2, 16], strides = [1, 1]} : vector<2x128xf32> to vector<2x16xf32>
    %32 = vector.extract_strided_slice %4 {offsets = [0, 0], sizes = [2, 112], strides = [1, 1]} : vector<2x128xf32> to vector<2x112xf32>
    %33 = tpu.concatenate %31, %32 in 1 : vector<2x16xf32>, vector<2x112xf32> -> vector<2x128xf32>
    %34 = arith.mulf %3, %33 : vector<2x128xf32>
    %35 = tpu.concatenate %6, %10, %14, %18, %22, %26, %30, %34 in 1 : vector<2x128xf32>, vector<2x128xf32>, vector<2x128xf32>, vector<2x128xf32>, vector<2x128xf32>, vector<2x128xf32>, vector<2x128xf32>, vector<2x128xf32> -> vector<2x1024xf32>
    %c0_3 = arith.constant 0 : index
    %c0_4 = arith.constant 0 : index
    %36 = vector.load %arg3[%c0_3, %c0_4] : memref<1024x64xf32, #tpu.memory_space<vmem>>, vector<1024x64xf32>
    %cst_5 = arith.constant dense<0.000000e+00> : vector<2x64xf32>
    %37 = tpu.matmul %35, %36, %cst_5 {dimension_numbers = #tpu.dot_dimension_numbers<[1], [0], [0], [1], [0, 0, 1, 1], [], []>} : vector<2x1024xf32>, vector<1024x64xf32>, vector<2x64xf32> -> vector<2x64xf32>
    %c0_6 = arith.constant 0 : index
    %c0_7 = arith.constant 0 : index
    %38 = vector.load %arg7[%c0_6, %c0_7] : memref<1x64xf32, #tpu.memory_space<vmem>>, vector<1x64xf32>
    %39 = vector.broadcast %38 : vector<1x64xf32> to vector<2x64xf32>
    %40 = arith.addf %37, %39 : vector<2x64xf32>
    %41 = vector.extract_strided_slice %40 {offsets = [0, 4], sizes = [2, 60], strides = [1, 1]} : vector<2x64xf32> to vector<2x60xf32>
    %42 = vector.extract_strided_slice %40 {offsets = [0, 0], sizes = [2, 4], strides = [1, 1]} : vector<2x64xf32> to vector<2x4xf32>
    %43 = tpu.concatenate %41, %42 in 1 : vector<2x60xf32>, vector<2x4xf32> -> vector<2x64xf32>
    %44 = arith.maximumf %40, %43 : vector<2x64xf32>
    %45 = vector.extract_strided_slice %44 {offsets = [0, 2], sizes = [2, 62], strides = [1, 1]} : vector<2x64xf32> to vector<2x62xf32>
    %46 = vector.extract_strided_slice %44 {offsets = [0, 0], sizes = [2, 2], strides = [1, 1]} : vector<2x64xf32> to vector<2x2xf32>
    %47 = tpu.concatenate %45, %46 in 1 : vector<2x62xf32>, vector<2x2xf32> -> vector<2x64xf32>
    %48 = arith.maximumf %44, %47 : vector<2x64xf32>
    %49 = vector.extract_strided_slice %48 {offsets = [0, 1], sizes = [2, 63], strides = [1, 1]} : vector<2x64xf32> to vector<2x63xf32>
    %50 = vector.extract_strided_slice %48 {offsets = [0, 0], sizes = [2, 1], strides = [1, 1]} : vector<2x64xf32> to vector<2x1xf32>
    %51 = tpu.concatenate %49, %50 in 1 : vector<2x63xf32>, vector<2x1xf32> -> vector<2x64xf32>
    %52 = arith.maximumf %48, %51 : vector<2x64xf32>
    %c0_8 = arith.constant 0 : index
    %c0_9 = arith.constant 0 : index
    %53 = vector.load %arg5[%c0_8, %c0_9] : memref<64x64xf32, #tpu.memory_space<vmem>>, vector<64x64xf32>
    %cst_10 = arith.constant dense<0.000000e+00> : vector<2x64xf32>
    %54 = tpu.matmul %52, %53, %cst_10 {dimension_numbers = #tpu.dot_dimension_numbers<[1], [0], [0], [1], [0, 0, 1, 1], [], []>} : vector<2x64xf32>, vector<64x64xf32>, vector<2x64xf32> -> vector<2x64xf32>
    %55 = arith.subf %40, %54 : vector<2x64xf32>
    %56 = math.exp %55 : vector<2x64xf32>
    %c0_11 = arith.constant 0 : index
    %c0_12 = arith.constant 0 : index
    %57 = vector.load %arg6[%c0_11, %c0_12] : memref<64x64xf32, #tpu.memory_space<vmem>>, vector<64x64xf32>
    %cst_13 = arith.constant dense<0.000000e+00> : vector<2x64xf32>
    %58 = tpu.matmul %56, %57, %cst_13 {dimension_numbers = #tpu.dot_dimension_numbers<[1], [0], [0], [1], [0, 0, 1, 1], [], []>} : vector<2x64xf32>, vector<64x64xf32>, vector<2x64xf32> -> vector<2x64xf32>
    %59 = arith.divf %56, %58 : vector<2x64xf32>
    %c0_14 = arith.constant 0 : index
    %c0_15 = arith.constant 0 : index
    %60 = vector.load %arg4[%c0_14, %c0_15] : memref<64x1024xf32, #tpu.memory_space<vmem>>, vector<64x1024xf32>
    %cst_16 = arith.constant dense<0.000000e+00> : vector<2x1024xf32>
    %61 = tpu.matmul %59, %60, %cst_16 {dimension_numbers = #tpu.dot_dimension_numbers<[1], [0], [0], [1], [0, 0, 1, 1], [], []>} : vector<2x64xf32>, vector<64x1024xf32>, vector<2x1024xf32> -> vector<2x1024xf32>
    %62 = vector.extract_strided_slice %61 {offsets = [0, 0], sizes = [2, 128], strides = [1, 1]} : vector<2x1024xf32> to vector<2x128xf32>
    %63 = arith.mulf %62, %5 : vector<2x128xf32>
    %64 = vector.extract_strided_slice %61 {offsets = [0, 128], sizes = [2, 128], strides = [1, 1]} : vector<2x1024xf32> to vector<2x128xf32>
    %65 = vector.extract_strided_slice %5 {offsets = [0, 16], sizes = [2, 112], strides = [1, 1]} : vector<2x128xf32> to vector<2x112xf32>
    %66 = vector.extract_strided_slice %5 {offsets = [0, 0], sizes = [2, 16], strides = [1, 1]} : vector<2x128xf32> to vector<2x16xf32>
    %67 = tpu.concatenate %65, %66 in 1 : vector<2x112xf32>, vector<2x16xf32> -> vector<2x128xf32>
    %68 = arith.mulf %64, %67 : vector<2x128xf32>
    %69 = arith.addf %63, %68 : vector<2x128xf32>
    %70 = vector.extract_strided_slice %61 {offsets = [0, 256], sizes = [2, 128], strides = [1, 1]} : vector<2x1024xf32> to vector<2x128xf32>
    %71 = vector.extract_strided_slice %5 {offsets = [0, 32], sizes = [2, 96], strides = [1, 1]} : vector<2x128xf32> to vector<2x96xf32>
    %72 = vector.extract_strided_slice %5 {offsets = [0, 0], sizes = [2, 32], strides = [1, 1]} : vector<2x128xf32> to vector<2x32xf32>
    %73 = tpu.concatenate %71, %72 in 1 : vector<2x96xf32>, vector<2x32xf32> -> vector<2x128xf32>
    %74 = arith.mulf %70, %73 : vector<2x128xf32>
    %75 = arith.addf %69, %74 : vector<2x128xf32>
    %76 = vector.extract_strided_slice %61 {offsets = [0, 384], sizes = [2, 128], strides = [1, 1]} : vector<2x1024xf32> to vector<2x128xf32>
    %77 = vector.extract_strided_slice %5 {offsets = [0, 48], sizes = [2, 80], strides = [1, 1]} : vector<2x128xf32> to vector<2x80xf32>
    %78 = vector.extract_strided_slice %5 {offsets = [0, 0], sizes = [2, 48], strides = [1, 1]} : vector<2x128xf32> to vector<2x48xf32>
    %79 = tpu.concatenate %77, %78 in 1 : vector<2x80xf32>, vector<2x48xf32> -> vector<2x128xf32>
    %80 = arith.mulf %76, %79 : vector<2x128xf32>
    %81 = arith.addf %75, %80 : vector<2x128xf32>
    %82 = vector.extract_strided_slice %61 {offsets = [0, 512], sizes = [2, 128], strides = [1, 1]} : vector<2x1024xf32> to vector<2x128xf32>
    %83 = vector.extract_strided_slice %5 {offsets = [0, 64], sizes = [2, 64], strides = [1, 1]} : vector<2x128xf32> to vector<2x64xf32>
    %84 = vector.extract_strided_slice %5 {offsets = [0, 0], sizes = [2, 64], strides = [1, 1]} : vector<2x128xf32> to vector<2x64xf32>
    %85 = tpu.concatenate %83, %84 in 1 : vector<2x64xf32>, vector<2x64xf32> -> vector<2x128xf32>
    %86 = arith.mulf %82, %85 : vector<2x128xf32>
    %87 = arith.addf %81, %86 : vector<2x128xf32>
    %88 = vector.extract_strided_slice %61 {offsets = [0, 640], sizes = [2, 128], strides = [1, 1]} : vector<2x1024xf32> to vector<2x128xf32>
    %89 = vector.extract_strided_slice %5 {offsets = [0, 80], sizes = [2, 48], strides = [1, 1]} : vector<2x128xf32> to vector<2x48xf32>
    %90 = vector.extract_strided_slice %5 {offsets = [0, 0], sizes = [2, 80], strides = [1, 1]} : vector<2x128xf32> to vector<2x80xf32>
    %91 = tpu.concatenate %89, %90 in 1 : vector<2x48xf32>, vector<2x80xf32> -> vector<2x128xf32>
    %92 = arith.mulf %88, %91 : vector<2x128xf32>
    %93 = arith.addf %87, %92 : vector<2x128xf32>
    %94 = vector.extract_strided_slice %61 {offsets = [0, 768], sizes = [2, 128], strides = [1, 1]} : vector<2x1024xf32> to vector<2x128xf32>
    %95 = vector.extract_strided_slice %5 {offsets = [0, 96], sizes = [2, 32], strides = [1, 1]} : vector<2x128xf32> to vector<2x32xf32>
    %96 = vector.extract_strided_slice %5 {offsets = [0, 0], sizes = [2, 96], strides = [1, 1]} : vector<2x128xf32> to vector<2x96xf32>
    %97 = tpu.concatenate %95, %96 in 1 : vector<2x32xf32>, vector<2x96xf32> -> vector<2x128xf32>
    %98 = arith.mulf %94, %97 : vector<2x128xf32>
    %99 = arith.addf %93, %98 : vector<2x128xf32>
    %100 = vector.extract_strided_slice %61 {offsets = [0, 896], sizes = [2, 128], strides = [1, 1]} : vector<2x1024xf32> to vector<2x128xf32>
    %101 = vector.extract_strided_slice %5 {offsets = [0, 112], sizes = [2, 16], strides = [1, 1]} : vector<2x128xf32> to vector<2x16xf32>
    %102 = vector.extract_strided_slice %5 {offsets = [0, 0], sizes = [2, 112], strides = [1, 1]} : vector<2x128xf32> to vector<2x112xf32>
    %103 = tpu.concatenate %101, %102 in 1 : vector<2x16xf32>, vector<2x112xf32> -> vector<2x128xf32>
    %104 = arith.mulf %100, %103 : vector<2x128xf32>
    %105 = arith.addf %99, %104 : vector<2x128xf32>
    %c0_17 = arith.constant 0 : index
    %c0_18 = arith.constant 0 : index
    %106 = vector.load %arg8[%c0_17, %c0_18] : memref<2x128xf32, #tpu.memory_space<vmem>>, vector<2x128xf32>
    tpu.vector_store %arg8[%c0_17, %c0_18], %105 {strides = array<i32>} : memref<2x128xf32, #tpu.memory_space<vmem>>, vector<2x128xf32>,
    return
  }
  func.func @transform_0(%arg0: i32) -> (i32, i32) {
    %c0_i32 = arith.constant 0 : i32
    %c0_i32_0 = arith.constant 0 : i32
    return %arg0, %c0_i32 : i32, i32
  }
  func.func @transform_1(%arg0: i32) -> (i32, i32) {
    %c0_i32 = arith.constant 0 : i32
    %c0_i32_0 = arith.constant 0 : i32
    %c0_i32_1 = arith.constant 0 : i32
    return %c0_i32, %c0_i32_0 : i32, i32
  }
  func.func @transform_2(%arg0: i32) -> (i32, i32) {
    %c0_i32 = arith.constant 0 : i32
    %c0_i32_0 = arith.constant 0 : i32
    %c0_i32_1 = arith.constant 0 : i32
    return %c0_i32, %c0_i32_0 : i32, i32
  }
  func.func @transform_3(%arg0: i32) -> (i32, i32) {
    %c0_i32 = arith.constant 0 : i32
    %c0_i32_0 = arith.constant 0 : i32
    %c0_i32_1 = arith.constant 0 : i32
    return %c0_i32, %c0_i32_0 : i32, i32
  }
  func.func @transform_4(%arg0: i32) -> (i32, i32) {
    %c0_i32 = arith.constant 0 : i32
    %c0_i32_0 = arith.constant 0 : i32
    %c0_i32_1 = arith.constant 0 : i32
    return %c0_i32, %c0_i32_0 : i32, i32
  }
  func.func @transform_5(%arg0: i32) -> (i32, i32) {
    %c0_i32 = arith.constant 0 : i32
    %c0_i32_0 = arith.constant 0 : i32
    %c0_i32_1 = arith.constant 0 : i32
    return %c0_i32, %c0_i32_0 : i32, i32
  }
  func.func @transform_6(%arg0: i32) -> (i32, i32) {
    %c0_i32 = arith.constant 0 : i32
    %c0_i32_0 = arith.constant 0 : i32
    %c0_i32_1 = arith.constant 0 : i32
    return %c0_i32, %c0_i32_0 : i32, i32
  }
  func.func @transform_7(%arg0: i32) -> (i32, i32) {
    %c0_i32 = arith.constant 0 : i32
    %c0_i32_0 = arith.constant 0 : i32
    return %arg0, %c0_i32 : i32, i32
  }
}

</mosaic_0001>

<bundles_post_ra>
// kernel: tpu_custom_call.1
= control target key start
LH: loop header
LB: loop body
LE: loop exit
PB: predicated region body
PF: predicated region fallthrough
CT: control target
= control target key end

     0   :  { %s2068_s0 = inlined_call_operand.vmem [shape: f32[2,256], index: 0, kind: input, shape index: {}]   ;;  %s2069_s1 = inlined_call_operand.vmem [shape: f32[256,384], index: 1, kind: input, shape index: {}]   ;;  %s2070_s2 = inlined_call_operand.vmem [shape: f32[1024,64], index: 2, kind: input, shape index: {}]   ;;  %s2071_s3 = inlined_call_operand.vmem [shape: f32[64,1024], index: 3, kind: input, shape index: {}]   ;;  %s2072_s4 = inlined_call_operand.vmem [shape: f32[64,64], index: 4, kind: input, shape index: {}]   ;;  %s2073_s5 = inlined_call_operand.vmem [shape: f32[64,64], index: 5, kind: input, shape index: {}]   ;;  %s2074_s6 = inlined_call_operand.vmem [shape: f32[1,64], index: 6, kind: input, shape index: {}]   ;;  %s2075_s7 = inlined_call_operand.hbm [shape: f32[2,128], index: 7, kind: output, shape index: {}]  }
   0x1   :  { %v74_v0 = vld [vmem:[%s2069_s1 + $0x170] sm:$0xff]  ;;  %v71_v2 = vld [vmem:[%s2069_s1 + $0x158] sm:$0xff]  ;;  %v68_v4 = vld [vmem:[%s2069_s1 + $0x140] sm:$0xff] }
   0x2   :  { %v122_v1 = vld [vmem:[%s2069_s1 + $0x2f0] sm:$0xff]  ;;  %170 = vmatpush.msra.mxu2 %v74_v0  ;;  %v119_v3 = vld [vmem:[%s2069_s1 + $0x2d8] sm:$0xff]  ;;  %v116_v5 = vld [vmem:[%s2069_s1 + $0x2c0] sm:$0xff] }
   0x3   :  { %190 = vmatpush.msra.mxu3 %v122_v1  ;;  %v73_v6 = vld [vmem:[%s2069_s1 + $0x168] sm:$0xff]  ;;  %v70_v8 = vld [vmem:[%s2069_s1 + $0x150] sm:$0xff]  ;;  %v67_v12 = vld [vmem:[%s2069_s1 + $0x138] sm:$0xff] }
   0x4   :  { %v121_v7 = vld [vmem:[%s2069_s1 + $0x2e8] sm:$0xff]  ;;  %171 = vmatpush.msra.mxu2 %v71_v2  ;;  %v118_v9 = vld [vmem:[%s2069_s1 + $0x2d0] sm:$0xff]  ;;  %130 = vmatpush.msra.mxu0 %v73_v6  ;;  %v115_v13 = vld [vmem:[%s2069_s1 + $0x2b8] sm:$0xff] }
   0x5   :  { %191 = vmatpush.msra.mxu3 %v119_v3  ;;  %150 = vmatpush.msra.mxu1 %v121_v7  ;;  %v65_v10 = vld [vmem:[%s2069_s1 + $0x128] sm:$0xff]  ;;  %v62_v14 = vld [vmem:[%s2069_s1 + $0x110] sm:$0xff]  ;;  %v64_v16 = vld [vmem:[%s2069_s1 + $0x120] sm:$0xff] }
   0x6   :  { %v113_v11 = vld [vmem:[%s2069_s1 + $0x2a8] sm:$0xff]  ;;  %172 = vmatpush.msra.mxu2 %v68_v4  ;;  %131 = vmatpush.msra.mxu0 %v70_v8  ;;  %v110_v15 = vld [vmem:[%s2069_s1 + $0x290] sm:$0xff]  ;;  %v112_v17 = vld [vmem:[%s2069_s1 + $0x2a0] sm:$0xff] }
   0x7   :  { %192 = vmatpush.msra.mxu3 %v116_v5  ;;  %151 = vmatpush.msra.mxu1 %v118_v9  ;;  %v59_v18 = vld [vmem:[%s2069_s1 + $0xf8] sm:$0xff]  ;;  %v61_v20 = vld [vmem:[%s2069_s1 + $0x108] sm:$0xff]  ;;  %v56_v22 = vld [vmem:[%s2069_s1 + $0xe0] sm:$0xff] }
   0x8   :  { %173 = vmatpush.msra.mxu2 %v65_v10  ;;  %132 = vmatpush.msra.mxu0 %v67_v12  ;;  %v107_v19 = vld [vmem:[%s2069_s1 + $0x278] sm:$0xff]  ;;  %v109_v21 = vld [vmem:[%s2069_s1 + $0x288] sm:$0xff]  ;;  %v104_v23 = vld [vmem:[%s2069_s1 + $0x260] sm:$0xff] }
   0x9   :  { %193 = vmatpush.msra.mxu3 %v113_v11  ;;  %152 = vmatpush.msra.mxu1 %v115_v13  ;;  %v58_v24 = vld [vmem:[%s2069_s1 + $0xf0] sm:$0xff]  ;;  %v53_v26 = vld [vmem:[%s2069_s1 + $0xc8] sm:$0xff]  ;;  %v55_v28 = vld [vmem:[%s2069_s1 + $0xd8] sm:$0xff] }
   0xa   :  { %174 = vmatpush.msra.mxu2 %v62_v14  ;;  %133 = vmatpush.msra.mxu0 %v64_v16  ;;  %v106_v25 = vld [vmem:[%s2069_s1 + $0x270] sm:$0xff]  ;;  %v101_v27 = vld [vmem:[%s2069_s1 + $0x248] sm:$0xff]  ;;  %v103_v29 = vld [vmem:[%s2069_s1 + $0x258] sm:$0xff] }
   0xb   :  { %194 = vmatpush.msra.mxu3 %v110_v15  ;;  %153 = vmatpush.msra.mxu1 %v112_v17  ;;  %v50_v30 = vld [vmem:[%s2069_s1 + $0xb0] sm:$0xff]  ;;  %v52_v32 = vld [vmem:[%s2069_s1 + $0xc0] sm:$0xff]  ;;  %v47_v34 = vld [vmem:[%s2069_s1 + $0x98] sm:$0xff] }
   0xc   :  { %175 = vmatpush.msra.mxu2 %v59_v18  ;;  %134 = vmatpush.msra.mxu0 %v61_v20  ;;  %v98_v31 = vld [vmem:[%s2069_s1 + $0x230] sm:$0xff]  ;;  %v100_v33 = vld [vmem:[%s2069_s1 + $0x240] sm:$0xff]  ;;  %v95_v35 = vld [vmem:[%s2069_s1 + $0x218] sm:$0xff] }
   0xd   :  { %195 = vmatpush.msra.mxu3 %v107_v19  ;;  %154 = vmatpush.msra.mxu1 %v109_v21  ;;  %v49_v36 = vld [vmem:[%s2069_s1 + $0xa8] sm:$0xff]  ;;  %v44_v38 = vld [vmem:[%s2069_s1 + $0x80] sm:$0xff]  ;;  %v46_v40 = vld [vmem:[%s2069_s1 + $0x90] sm:$0xff] }
   0xe   :  { %176 = vmatpush.msra.mxu2 %v56_v22  ;;  %135 = vmatpush.msra.mxu0 %v58_v24  ;;  %v97_v37 = vld [vmem:[%s2069_s1 + $0x228] sm:$0xff]  ;;  %v92_v39 = vld [vmem:[%s2069_s1 + $0x200] sm:$0xff]  ;;  %v94_v41 = vld [vmem:[%s2069_s1 + $0x210] sm:$0xff] }
   0xf   :  { %196 = vmatpush.msra.mxu3 %v104_v23  ;;  %155 = vmatpush.msra.mxu1 %v106_v25  ;;  %v27_v42 = vld [vmem:[%s2068_s0] sm:$0xf]  ;;  %v41_v43 = vld [vmem:[%s2069_s1 + $0x68] sm:$0xff]  ;;  %v43_v45 = vld [vmem:[%s2069_s1 + $0x78] sm:$0xff] }
  0x10   :  { %177 = vmatpush.msra.mxu2 %v53_v26  ;;  %136 = vmatpush.msra.mxu0 %v55_v28  ;;  %v89_v44 = vld [vmem:[%s2069_s1 + $0x1e8] sm:$0xff]  ;;  %125 = vst [vmem:[#allocation1] ss:$4 sm:$0xff] %v27_v42  ;;  %v91_v46 = vld [vmem:[%s2069_s1 + $0x1f8] sm:$0xff]  ;;  %v38_v47 = vld [vmem:[%s2069_s1 + $0x50] sm:$0xff] }
  0x11   :  { %197 = vmatpush.msra.mxu3 %v101_v27  ;;  %156 = vmatpush.msra.mxu1 %v103_v29  ;;  %v86_v48 = vld [vmem:[%s2069_s1 + $0x1d0] sm:$0xff]  ;;  %v40_v49 = vld [vmem:[%s2069_s1 + $0x60] sm:$0xff]  ;;  %v35_v51 = vld [vmem:[%s2069_s1 + $0x38] sm:$0xff] }
  0x12   :  { %178 = vmatpush.msra.mxu2 %v50_v30  ;;  %137 = vmatpush.msra.mxu0 %v52_v32  ;;  %v88_v50 = vld [vmem:[%s2069_s1 + $0x1e0] sm:$0xff]  ;;  %v83_v52 = vld [vmem:[%s2069_s1 + $0x1b8] sm:$0xff]  ;;  %v37_v54 = vld [vmem:[%s2069_s1 + $0x48] sm:$0xff] }
  0x13   :  { %198 = vmatpush.msra.mxu3 %v98_v31  ;;  %157 = vmatpush.msra.mxu1 %v100_v33  ;;  %v32_v53 = vld [vmem:[%s2069_s1 + $0x20] sm:$0xff]  ;;  %v85_v55 = vld [vmem:[%s2069_s1 + $0x1c8] sm:$0xff] }
  0x14   :  { %179 = vmatpush.msra.mxu2 %v47_v34  ;;  %138 = vmatpush.msra.mxu0 %v49_v36  ;;  %v80_v56 = vld [vmem:[%s2069_s1 + $0x1a0] sm:$0xff] }
  0x15   :  { %199 = vmatpush.msra.mxu3 %v95_v35  ;;  %158 = vmatpush.msra.mxu1 %v97_v37 }
  0x16   :  { %180 = vmatpush.msra.mxu2 %v44_v38  ;;  %139 = vmatpush.msra.mxu0 %v46_v40 }
  0x17   :  { %200 = vmatpush.msra.mxu3 %v92_v39  ;;  %159 = vmatpush.msra.mxu1 %v94_v41 }
  0x18   :  { %181 = vmatpush.msra.mxu2 %v41_v43  ;;  %140 = vmatpush.msra.mxu0 %v43_v45 }
  0x19   :  { %201 = vmatpush.msra.mxu3 %v89_v44  ;;  %160 = vmatpush.msra.mxu1 %v91_v46 }
  0x1a   :  { %182 = vmatpush.msra.mxu2 %v38_v47  ;;  %141 = vmatpush.msra.mxu0 %v40_v49 }
  0x1b   :  { %202 = vmatpush.msra.mxu3 %v86_v48  ;;  %161 = vmatpush.msra.mxu1 %v88_v50 }
  0x1c   :  { %12 = vsyncpa [#allocation3], 0  ;;  %183 = vmatpush.msra.mxu2 %v35_v51  ;;  %v34_v57 = vld [vmem:[%s2069_s1 + $0x30] sm:$0xff]  ;;  %142 = vmatpush.msra.mxu0 %v37_v54  ;;  %v29_v59 = vld [vmem:[%s2069_s1 + $0x8] sm:$0xff]  ;;  %s1019_s10 = smov 80   ;;  %s1020_s11 = smov 96  }
  0x1d   :  { %203 = vmatpush.msra.mxu3 %v83_v52  ;;  %v82_v58 = vld [vmem:[%s2069_s1 + $0x1b0] sm:$0xff]  ;;  %162 = vmatpush.msra.mxu1 %v85_v55  ;;  %v77_v60 = vld [vmem:[%s2069_s1 + $0x188] sm:$0xff]  ;;  %v1256_v61 = vld.sshfl [vmem:[#allocation1] sm:$0xff pattern:$0x73625140]  ;;  %s1021_s16 = smov 112  }
  0x1e   :  { %184 = vmatpush.msra.mxu2 %v32_v53  ;;  %v1258_v62 = vld.sshfl [vmem:[#allocation1 + $0x8] sm:$0xff pattern:$0x73625140]  ;;  %143 = vmatpush.msra.mxu0 %v34_v57  ;;  %v31_v63 = vld [vmem:[%s2069_s1 + $0x18] sm:$0xff]  ;;  %v28_v2 = vld [vmem:[%s2069_s1] sm:$0xff]  ;;  %s1022_s13 = smov 32  }
  0x1f   :  { %204 = vmatpush.msra.mxu3 %v80_v56  ;;  %163 = vmatpush.msra.mxu1 %v82_v58  ;;  %v79_v0 = vld [vmem:[%s2069_s1 + $0x198] sm:$0xff]  ;;  %v76_v3 = vld [vmem:[%s2069_s1 + $0x180] sm:$0xff]  ;;  %v295_v4 = vld [vmem:[%s2070_s2 + $0x70] sm:$0xff]  ;;  %s1023_s14 = smov 48   ;;  %s1024_s18 = smov 64   ;;  %vm580_vm0 = vcmask 490496  }
  0x20   :  { %185 = vmatpush.msra.mxu2 %v29_v59  ;;  %v296_v1 = vld [vmem:[%s2070_s2 + $0x78] sm:$0xff]  ;;  %144 = vmatpush.msra.mxu0 %v31_v63  ;;  %v294_v5 = vld [vmem:[%s2070_s2 + $0x68] sm:$0xff]  ;;  %v293_v6 = vld [vmem:[%s2070_s2 + $0x60] sm:$0xff]  ;;  %s1025_s26 = smov 16   ;;  %s1026_s8 = smov 60   ;;  %vm590_vm1 = vcmask 506880  }
  0x21   :  { %205 = vmatpush.msra.mxu3 %v77_v60  ;;  %186 = vmatmul.f32.vlgmr.msra.gmra.mxu2 %v1256_v61  ;;  %v292_v7 = vld [vmem:[%s2070_s2 + $0x58] sm:$0xff]  ;;  %v291_v8 = vld [vmem:[%s2070_s2 + $0x50] sm:$0xff]  ;;  %v290_v9 = vld [vmem:[%s2070_s2 + $0x48] sm:$0xff]  ;;  %s1028_s9 = smov 62   ;;  %s1029_s12 = smov 126   ;;  %vm600_vm2 = vcmask 515072  }
  0x22   :  { %206 = vmatmul.f32.vlgmr.msra.gmra.mxu3 %v1258_v62  ;;  %164 = vmatpush.msra.mxu1 %v79_v0  ;;  %v289_v10 = vld [vmem:[%s2070_s2 + $0x40] sm:$0xff]  ;;  %v288_v11 = vld [vmem:[%s2070_s2 + $0x38] sm:$0xff]  ;;  %v287_v12 = vld [vmem:[%s2070_s2 + $0x30] sm:$0xff]  ;;  %s1030_s15 = smov 63   ;;  %s1031_s17 = smov 127   ;;  %vm267_vm3 = vcmask 523264  }
  0x23   :  { %413 = vmatpush.msrb.mxu2 %v296_v1  ;;  %145 = vmatpush.msra.mxu0 %v28_v2  ;;  %v286_v13 = vld [vmem:[%s2070_s2 + $0x28] sm:$0xff]  ;;  %v285_v14 = vld [vmem:[%s2070_s2 + $0x20] sm:$0xff]  ;;  %v284_v15 = vld [vmem:[%s2070_s2 + $0x18] sm:$0xff]  ;;  %s955_s30 = sshll.u32 %s2075_s7, 4  ;;  %s956_s30 = int_to_ptr.hbm [resolvable:$true] %s955_s30 }
  0x24   :  { %165 = vmatpush.msra.mxu1 %v76_v3  ;;  %146 = vmatmul.f32.vlgmr.msra.gmra.mxu0 %v1256_v61  ;;  %v283_v16 = vld [vmem:[%s2070_s2 + $0x10] sm:$0xff]  ;;  %v282_v17 = vld [vmem:[%s2070_s2 + $0x8] sm:$0xff]  ;;  %v281_v18 = vld [vmem:[%s2070_s2] sm:$0xff] }
  0x25   :  { %166 = vmatmul.f32.vlgmr.msra.gmra.mxu1 %v1258_v62  ;;  %414 = vmatpush.msrb.mxu2 %v295_v4  ;;  %v123_v19 = vld [vmem:[%s2069_s1 + $0x2f8] sm:$0xff]  ;;  %v120_v21 = vld [vmem:[%s2069_s1 + $0x2e0] sm:$0xff]  ;;  %v117_v23 = vld [vmem:[%s2069_s1 + $0x2c8] sm:$0xff] }
  0x26   :  { %v75_v20 = vld [vmem:[%s2069_s1 + $0x178] sm:$0xff]  ;;  %230 = vmatpush.msrb.mxu1 %v123_v19  ;;  %v72_v22 = vld [vmem:[%s2069_s1 + $0x160] sm:$0xff]  ;;  %v69_v24 = vld [vmem:[%s2069_s1 + $0x148] sm:$0xff] }
  0x27   :  { %415 = vmatpush.msrb.mxu2 %v294_v5  ;;  %210 = vmatpush.msrb.mxu0 %v75_v20  ;;  %v114_v25 = vld [vmem:[%s2069_s1 + $0x2b0] sm:$0xff]  ;;  %v111_v27 = vld [vmem:[%s2069_s1 + $0x298] sm:$0xff]  ;;  %v108_v29 = vld [vmem:[%s2069_s1 + $0x280] sm:$0xff] }
  0x28   :  { %231 = vmatpush.msrb.mxu1 %v120_v21  ;;  %v66_v26 = vld [vmem:[%s2069_s1 + $0x130] sm:$0xff]  ;;  %v63_v28 = vld [vmem:[%s2069_s1 + $0x118] sm:$0xff]  ;;  %v60_v30 = vld [vmem:[%s2069_s1 + $0x100] sm:$0xff] }
  0x29   :  { %416 = vmatpush.msrb.mxu2 %v293_v6  ;;  %211 = vmatpush.msrb.mxu0 %v72_v22  ;;  %v105_v33 = vld [vmem:[%s2069_s1 + $0x268] sm:$0xff]  ;;  %v312_v36 = vld [vmem:[%s2070_s2 + $0xf8] sm:$0xff]  ;;  %v311_v39 = vld [vmem:[%s2070_s2 + $0xf0] sm:$0xff] }
  0x2a   :  { %232 = vmatpush.msrb.mxu1 %v117_v23  ;;  %v57_v34 = vld [vmem:[%s2069_s1 + $0xe8] sm:$0xff]  ;;  %433 = vmatpush.msrb.mxu3 %v312_v36  ;;  %v102_v41 = vld [vmem:[%s2069_s1 + $0x250] sm:$0xff]  ;;  %v99_v44 = vld [vmem:[%s2069_s1 + $0x238] sm:$0xff] }
  0x2b   :  { %417 = vmatpush.msrb.mxu2 %v292_v7  ;;  %212 = vmatpush.msrb.mxu0 %v69_v24  ;;  %v54_v42 = vld [vmem:[%s2069_s1 + $0xd0] sm:$0xff]  ;;  %v310_v45 = vld [vmem:[%s2070_s2 + $0xe8] sm:$0xff]  ;;  %v51_v46 = vld [vmem:[%s2069_s1 + $0xb8] sm:$0xff] }
  0x2c   :  { %233 = vmatpush.msrb.mxu1 %v114_v25  ;;  %434 = vmatpush.msrb.mxu3 %v311_v39  ;;  %v96_v47 = vld [vmem:[%s2069_s1 + $0x220] sm:$0xff]  ;;  %v93_v50 = vld [vmem:[%s2069_s1 + $0x208] sm:$0xff]  ;;  %v308_v51 = vld [vmem:[%s2070_s2 + $0xd8] sm:$0xff] }
  0x2d   :  { %418 = vmatpush.msrb.mxu2 %v291_v8  ;;  %213 = vmatpush.msrb.mxu0 %v66_v26  ;;  %v309_v48 = vld [vmem:[%s2070_s2 + $0xe0] sm:$0xff]  ;;  %v45_v52 = vld [vmem:[%s2069_s1 + $0x88] sm:$0xff]  ;;  %v90_v53 = vld [vmem:[%s2069_s1 + $0x1f0] sm:$0xff] }
  0x2e   :  { %234 = vmatpush.msrb.mxu1 %v111_v27  ;;  %v48_v49 = vld [vmem:[%s2069_s1 + $0xa0] sm:$0xff]  ;;  %435 = vmatpush.msrb.mxu3 %v310_v45  ;;  %v307_v54 = vld [vmem:[%s2070_s2 + $0xd0] sm:$0xff]  ;;  %v87_v56 = vld [vmem:[%s2069_s1 + $0x1d8] sm:$0xff] }
  0x2f   :  { %419 = vmatpush.msrb.mxu2 %v290_v9  ;;  %214 = vmatpush.msrb.mxu0 %v63_v28  ;;  %v42_v55 = vld [vmem:[%s2069_s1 + $0x70] sm:$0xff]  ;;  %v306_v57 = vld [vmem:[%s2070_s2 + $0xc8] sm:$0xff]  ;;  %v39_v58 = vld [vmem:[%s2069_s1 + $0x58] sm:$0xff] }
  0x30   :  { %235 = vmatpush.msrb.mxu1 %v108_v29  ;;  %436 = vmatpush.msrb.mxu3 %v309_v48  ;;  %v84_v59 = vld [vmem:[%s2069_s1 + $0x1c0] sm:$0xff]  ;;  %v81_v0 = vld [vmem:[%s2069_s1 + $0x1a8] sm:$0xff]  ;;  %v304_v1 = vld [vmem:[%s2070_s2 + $0xb8] sm:$0xff] }
  0x31   :  { %420 = vmatpush.msrb.mxu2 %v289_v10  ;;  %215 = vmatpush.msrb.mxu0 %v60_v30  ;;  %v305_v60 = vld [vmem:[%s2070_s2 + $0xc0] sm:$0xff]  ;;  %v33_v2 = vld [vmem:[%s2069_s1 + $0x28] sm:$0xff]  ;;  %v78_v3 = vld [vmem:[%s2069_s1 + $0x190] sm:$0xff] }
  0x32   :  { %236 = vmatpush.msrb.mxu1 %v105_v33  ;;  %437 = vmatpush.msrb.mxu3 %v308_v51  ;;  %v36_v63 = vld [vmem:[%s2069_s1 + $0x40] sm:$0xff]  ;;  %v303_v4 = vld [vmem:[%s2070_s2 + $0xb0] sm:$0xff]  ;;  %v344_v6 = vld [vmem:[%s2070_s2 + $0x1f8] sm:$0xff] }
  0x33   :  { %421 = vmatpush.msrb.mxu2 %v288_v11  ;;  %216 = vmatpush.msrb.mxu0 %v57_v34  ;;  %v30_v5 = vld [vmem:[%s2069_s1 + $0x10] sm:$0xff]  ;;  %v328_v7 = vld [vmem:[%s2070_s2 + $0x178] sm:$0xff]  ;;  %v302_v8 = vld [vmem:[%s2070_s2 + $0xa8] sm:$0xff] }
  0x34   :  { %237 = vmatpush.msrb.mxu1 %v102_v41  ;;  %438 = vmatpush.msrb.mxu3 %v307_v54  ;;  %v343_v9 = vld [vmem:[%s2070_s2 + $0x1f0] sm:$0xff]  ;;  %v342_v11 = vld [vmem:[%s2070_s2 + $0x1e8] sm:$0xff]  ;;  %v337_v22 = vld [vmem:[%s2070_s2 + $0x1c0] sm:$0xff] }
  0x35   :  { %422 = vmatpush.msrb.mxu2 %v287_v12  ;;  %217 = vmatpush.msrb.mxu0 %v54_v42  ;;  %v327_v10 = vld [vmem:[%s2070_s2 + $0x170] sm:$0xff]  ;;  %v301_v12 = vld [vmem:[%s2070_s2 + $0xa0] sm:$0xff]  ;;  %v338_v20 = vld [vmem:[%s2070_s2 + $0x1c8] sm:$0xff] }
  0x36   :  { %238 = vmatpush.msrb.mxu1 %v99_v44  ;;  %439 = vmatpush.msrb.mxu3 %v306_v57  ;;  %v323_v19 = vld [vmem:[%s2070_s2 + $0x150] sm:$0xff]  ;;  %v322_v21 = vld [vmem:[%s2070_s2 + $0x148] sm:$0xff]  ;;  %v321_v23 = vld [vmem:[%s2070_s2 + $0x140] sm:$0xff] }
  0x37   :  { %423 = vmatpush.msrb.mxu2 %v286_v13  ;;  %218 = vmatpush.msrb.mxu0 %v51_v46  ;;  %v326_v13 = vld [vmem:[%s2070_s2 + $0x168] sm:$0xff]  ;;  %v336_v24 = vld [vmem:[%s2070_s2 + $0x1b8] sm:$0xff]  ;;  %v335_v26 = vld [vmem:[%s2070_s2 + $0x1b0] sm:$0xff] }
  0x38   :  { %239 = vmatpush.msrb.mxu1 %v96_v47  ;;  %440 = vmatpush.msrb.mxu3 %v305_v60  ;;  %v320_v25 = vld [vmem:[%s2070_s2 + $0x138] sm:$0xff]  ;;  %v319_v27 = vld [vmem:[%s2070_s2 + $0x130] sm:$0xff]  ;;  %v334_v28 = vld [vmem:[%s2070_s2 + $0x1a8] sm:$0xff] }
  0x39   :  { %424 = vmatpush.msrb.mxu2 %v285_v14  ;;  %219 = vmatpush.msrb.mxu0 %v48_v49  ;;  %v341_v14 = vld [vmem:[%s2070_s2 + $0x1e0] sm:$0xff]  ;;  %v318_v29 = vld [vmem:[%s2070_s2 + $0x128] sm:$0xff]  ;;  %v316_v33 = vld [vmem:[%s2070_s2 + $0x118] sm:$0xff] }
  0x3a   :  { %240 = vmatpush.msrb.mxu1 %v93_v50  ;;  %441 = vmatpush.msrb.mxu3 %v304_v1  ;;  %v333_v30 = vld [vmem:[%s2070_s2 + $0x1a0] sm:$0xff]  ;;  %v331_v34 = vld [vmem:[%s2070_s2 + $0x190] sm:$0xff]  ;;  %v314_v39 = vld [vmem:[%s2070_s2 + $0x108] sm:$0xff] }
  0x3b   :  { %425 = vmatpush.msrb.mxu2 %v284_v15  ;;  %220 = vmatpush.msrb.mxu0 %v45_v52  ;;  %v300_v15 = vld [vmem:[%s2070_s2 + $0x98] sm:$0xff]  ;;  %v315_v36 = vld [vmem:[%s2070_s2 + $0x110] sm:$0xff]  ;;  %v297_v41 = vld [vmem:[%s2070_s2 + $0x80] sm:$0xff] }
  0x3c   :  { %241 = vmatpush.msrb.mxu1 %v90_v53  ;;  %442 = vmatpush.msrb.mxu3 %v303_v4  ;;  %v313_v42 = vld [vmem:[%s2070_s2 + $0x100] sm:$0xff]  ;;  %v376_v44 = vld [vmem:[%s2070_s2 + $0x2f8] sm:$0xff]  ;;  %v359_v46 = vld [vmem:[%s2070_s2 + $0x270] sm:$0xff] }
  0x3d   :  { %426 = vmatpush.msrb.mxu2 %v283_v16  ;;  %221 = vmatpush.msrb.mxu0 %v42_v55  ;;  %v325_v16 = vld [vmem:[%s2070_s2 + $0x160] sm:$0xff]  ;;  %v392_v45 = vld [vmem:[%s2070_s2 + $0x378] sm:$0xff]  ;;  %v375_v47 = vld [vmem:[%s2070_s2 + $0x2f0] sm:$0xff] }
  0x3e   :  { %242 = vmatpush.msrb.mxu1 %v87_v56  ;;  %443 = vmatpush.msrb.mxu3 %v302_v8  ;;  %v391_v48 = vld [vmem:[%s2070_s2 + $0x370] sm:$0xff]  ;;  %v358_v49 = vld [vmem:[%s2070_s2 + $0x268] sm:$0xff]  ;;  %v357_v52 = vld [vmem:[%s2070_s2 + $0x260] sm:$0xff] }
  0x3f   :  { %427 = vmatpush.msrb.mxu2 %v282_v17  ;;  %222 = vmatpush.msrb.mxu0 %v39_v58  ;;  %v299_v17 = vld [vmem:[%s2070_s2 + $0x90] sm:$0xff]  ;;  %v374_v50 = vld [vmem:[%s2070_s2 + $0x2e8] sm:$0xff]  ;;  %v373_v53 = vld [vmem:[%s2070_s2 + $0x2e0] sm:$0xff] }
  0x40   :  { %243 = vmatpush.msrb.mxu1 %v84_v59  ;;  %444 = vmatpush.msrb.mxu3 %v301_v12  ;;  %v390_v51 = vld [vmem:[%s2070_s2 + $0x368] sm:$0xff]  ;;  %v389_v54 = vld [vmem:[%s2070_s2 + $0x360] sm:$0xff]  ;;  %v356_v55 = vld [vmem:[%s2070_s2 + $0x258] sm:$0xff] }
  0x41   :  { %428 = vmatpush.msrb.mxu2 %v281_v18  ;;  %223 = vmatpush.msrb.mxu0 %v36_v63  ;;  %v339_v18 = vld [vmem:[%s2070_s2 + $0x1d0] sm:$0xff]  ;;  %v372_v56 = vld [vmem:[%s2070_s2 + $0x2d8] sm:$0xff]  ;;  %v406_v1 = vld [vmem:[%s2070_s2 + $0x3e8] sm:$0xff] }
  0x42   :  { %244 = vmatpush.msrb.mxu1 %v81_v0  ;;  %445 = vmatpush.msrb.mxu3 %v300_v15  ;;  %v388_v57 = vld [vmem:[%s2070_s2 + $0x358] sm:$0xff]  ;;  %v355_v59 = vld [vmem:[%s2070_s2 + $0x250] sm:$0xff]  ;;  %v386_v4 = vld [vmem:[%s2070_s2 + $0x348] sm:$0xff] }
  0x43   :  { %224 = vmatpush.msrb.mxu0 %v33_v2  ;;  %v408_v58 = vld [vmem:[%s2070_s2 + $0x3f8] sm:$0xff]  ;;  %v371_v60 = vld [vmem:[%s2070_s2 + $0x2d0] sm:$0xff]  ;;  %v354_v2 = vld [vmem:[%s2070_s2 + $0x248] sm:$0xff] }
  0x44   :  { %245 = vmatpush.msrb.mxu1 %v78_v3  ;;  %446 = vmatpush.msrb.mxu3 %v299_v17  ;;  %v407_v63 = vld [vmem:[%s2070_s2 + $0x3f0] sm:$0xff]  ;;  %v370_v3 = vld [vmem:[%s2070_s2 + $0x2c8] sm:$0xff]  ;;  %v385_v8 = vld [vmem:[%s2070_s2 + $0x340] sm:$0xff] }
  0x45   :  { %225 = vmatpush.msrb.mxu0 %v30_v5  ;;  %246 = vmatmul.f32.vlgmr.msrb.gmra.mxu1 %v1258_v62  ;;  %v324_v62 = vld [vmem:[%s2070_s2 + $0x158] sm:$0xff]  ;;  %v387_v0 = vld [vmem:[%s2070_s2 + $0x350] sm:$0xff]  ;;  %v405_v5 = vld [vmem:[%s2070_s2 + $0x3e0] sm:$0xff] }
  0x46   :  { %473 = vmatpush.msra.mxu1 %v344_v6  ;;  %226 = vmatmul.f32.vlgmr.msrb.gmra.mxu0 %v1256_v61  ;;  %v340_v61 = vld [vmem:[%s2070_s2 + $0x1d8] sm:$0xff]  ;;  %v353_v6 = vld [vmem:[%s2070_s2 + $0x240] sm:$0xff]  ;;  %v367_v15 = vld [vmem:[%s2070_s2 + $0x2b0] sm:$0xff] }
  0x47   :  { %453 = vmatpush.msra.mxu0 %v328_v7  ;;  %v369_v7 = vld [vmem:[%s2070_s2 + $0x2c0] sm:$0xff]  ;;  %v384_v12 = vld [vmem:[%s2070_s2 + $0x338] sm:$0xff]  ;;  %v350_v17 = vld [vmem:[%s2070_s2 + $0x228] sm:$0xff] }
  0x48   :  { %474 = vmatpush.msra.mxu1 %v343_v9  ;;  %v404_v9 = vld [vmem:[%s2070_s2 + $0x3d8] sm:$0xff] }
  0x49   :  { %454 = vmatpush.msra.mxu0 %v327_v10  ;;  %v352_v10 = vld [vmem:[%s2070_s2 + $0x238] sm:$0xff] }
  0x4a   :  { %475 = vmatpush.msra.mxu1 %v342_v11  ;;  %v368_v11 = vld [vmem:[%s2070_s2 + $0x2b8] sm:$0xff] }
  0x4b   :  { %455 = vmatpush.msra.mxu0 %v326_v13  ;;  %v403_v13 = vld [vmem:[%s2070_s2 + $0x3d0] sm:$0xff] }
  0x4c   :  { %476 = vmatpush.msra.mxu1 %v341_v14  ;;  %v351_v14 = vld [vmem:[%s2070_s2 + $0x230] sm:$0xff] }
  0x4d   :  { %456 = vmatpush.msra.mxu0 %v325_v16  ;;  %v383_v16 = vld [vmem:[%s2070_s2 + $0x330] sm:$0xff] }
  0x4e   :  { %477 = vmatpush.msra.mxu1 %v340_v61  ;;  %v402_v61 = vld [vmem:[%s2070_s2 + $0x3c8] sm:$0xff] }
  0x4f   :  { %457 = vmatpush.msra.mxu0 %v324_v62  ;;  %v366_v62 = vld [vmem:[%s2070_s2 + $0x2a8] sm:$0xff] }
  0x50   :  { %478 = vmatpush.msra.mxu1 %v339_v18  ;;  %v382_v18 = vld [vmem:[%s2070_s2 + $0x328] sm:$0xff] }
  0x51   :  { %458 = vmatpush.msra.mxu0 %v323_v19  ;;  %v349_v19 = vld [vmem:[%s2070_s2 + $0x220] sm:$0xff] }
  0x52   :  { %479 = vmatpush.msra.mxu1 %v338_v20  ;;  %v365_v20 = vld [vmem:[%s2070_s2 + $0x2a0] sm:$0xff] }
  0x53   :  { %459 = vmatpush.msra.mxu0 %v322_v21  ;;  %v381_v21 = vld [vmem:[%s2070_s2 + $0x320] sm:$0xff] }
  0x54   :  { %480 = vmatpush.msra.mxu1 %v337_v22  ;;  %v401_v22 = vld [vmem:[%s2070_s2 + $0x3c0] sm:$0xff] }
  0x55   :  { %460 = vmatpush.msra.mxu0 %v321_v23  ;;  %v348_v23 = vld [vmem:[%s2070_s2 + $0x218] sm:$0xff] }
  0x56   :  { %481 = vmatpush.msra.mxu1 %v336_v24  ;;  %v364_v24 = vld [vmem:[%s2070_s2 + $0x298] sm:$0xff] }
  0x57   :  { %461 = vmatpush.msra.mxu0 %v320_v25  ;;  %v380_v25 = vld [vmem:[%s2070_s2 + $0x318] sm:$0xff] }
  0x58   :  { %482 = vmatpush.msra.mxu1 %v335_v26  ;;  %v400_v26 = vld [vmem:[%s2070_s2 + $0x3b8] sm:$0xff] }
  0x59   :  { %462 = vmatpush.msra.mxu0 %v319_v27  ;;  %v347_v27 = vld [vmem:[%s2070_s2 + $0x210] sm:$0xff] }
  0x5a   :  { %483 = vmatpush.msra.mxu1 %v334_v28  ;;  %v363_v28 = vld [vmem:[%s2070_s2 + $0x290] sm:$0xff] }
  0x5b   :  { %463 = vmatpush.msra.mxu0 %v318_v29  ;;  %v379_v29 = vld [vmem:[%s2070_s2 + $0x310] sm:$0xff] }
  0x5c   :  { %484 = vmatpush.msra.mxu1 %v333_v30  ;;  %v399_v30 = vld [vmem:[%s2070_s2 + $0x3b0] sm:$0xff] }
  0xa1   :  { %v147_v31 = vpop.f32.mrf.mxu0 }
  0xa2   :  { %v167_v32 = vpop.f32.mrf.mxu1 }
  0xa3   :  { %v1366_v35 = vadd.f32 %v167_v32, %v147_v31  ;;  %v317_v31 = vld [vmem:[%s2070_s2 + $0x120] sm:$0xff]  ;;  %v332_v32 = vld [vmem:[%s2070_s2 + $0x198] sm:$0xff] }
  0xa4   :  { %v187_v37 = vpop.f32.mrf.mxu2  ;;  %464 = vmatpush.msra.mxu0 %v317_v31  ;;  %485 = vmatpush.msra.mxu1 %v332_v32  ;;  %v346_v31 = vld [vmem:[%s2070_s2 + $0x208] sm:$0xff] }
  0xa5   :  { %v207_v38 = vpop.f32.mrf.mxu3  ;;  %v362_v32 = vld [vmem:[%s2070_s2 + $0x288] sm:$0xff] }
  0xa6   :  { %v1374_v40 = vadd.f32 %v207_v38, %v187_v37  ;;  %465 = vmatpush.msra.mxu0 %v316_v33  ;;  %v330_v37 = vld [vmem:[%s2070_s2 + $0x188] sm:$0xff]  ;;  %486 = vmatpush.msra.mxu1 %v331_v34 }
  0xa7   :  { %v298_v38 = vld [vmem:[%s2070_s2 + $0x88] sm:$0xff] }
  0xa8   :  { %260 = vrot.lane.b32.xlu2 %v1374_v40, %s1019_s10  ;;  %256 = vrot.lane.b32.xlu1 %v1374_v40, %s1020_s11  ;;  %v250_v43 = vmul.f32 %v1374_v40, %v1366_v35  ;;  %v398_v33 = vld [vmem:[%s2070_s2 + $0x3a8] sm:$0xff] }
  0xa9   :  { %252 = vrot.lane.b32.xlu0 %v1374_v40, %s1021_s16  ;;  %466 = vmatpush.msra.mxu0 %v315_v36  ;;  %v378_v36 = vld [vmem:[%s2070_s2 + $0x308] sm:$0xff] }
  0xaa   :  { %429 = vmatmul.f32.vlgmr.msrb.gmra.mxu2 %v250_v43  ;;  %487 = vmatpush.msra.mxu1 %v330_v37  ;;  %v360_v43 = vld [vmem:[%s2070_s2 + $0x278] sm:$0xff] }
  0xab   :  { %447 = vmatpush.msrb.mxu3 %v298_v38  ;;  %467 = vmatpush.msra.mxu0 %v314_v39  ;;  %v345_v38 = vld [vmem:[%s2070_s2 + $0x200] sm:$0xff] }
  0xac   :  { %493 = vmatpush.msra.mxu2 %v360_v43  ;;  %v361_v39 = vld [vmem:[%s2070_s2 + $0x280] sm:$0xff]  ;;  %v395_v43 = vld [vmem:[%s2070_s2 + $0x390] sm:$0xff] }
  0xad   :  { %448 = vmatpush.msrb.mxu3 %v297_v41  ;;  %468 = vmatpush.msra.mxu0 %v313_v42  ;;  %v397_v41 = vld [vmem:[%s2070_s2 + $0x3a0] sm:$0xff]  ;;  %v396_v42 = vld [vmem:[%s2070_s2 + $0x398] sm:$0xff] }
  0xae   :  { %494 = vmatpush.msra.mxu2 %v359_v46 }
  0xaf   :  { %513 = vmatpush.msra.mxu3 %v376_v44  ;;  %533 = vmatpush.msrb.mxu0 %v392_v45  ;;  %v394_v44 = vld [vmem:[%s2070_s2 + $0x388] sm:$0xff]  ;;  %v393_v45 = vld [vmem:[%s2070_s2 + $0x380] sm:$0xff] }
  0xb0   :  { %273 = vrot.lane.b32.xlu2 %v1374_v40, %s1022_s13  ;;  %269 = vrot.lane.b32.xlu1 %v1374_v40, %s1023_s14 }
  0xb1   :  { %264 = vrot.lane.b32.xlu0 %v1374_v40, %s1024_s18  ;;  %514 = vmatpush.msra.mxu3 %v375_v47 }
  0xb2   :  { %534 = vmatpush.msrb.mxu0 %v391_v48  ;;  %495 = vmatpush.msra.mxu2 %v358_v49 }
  0xb3   :  { %515 = vmatpush.msra.mxu3 %v374_v50 }
  0xb4   :  { %535 = vmatpush.msrb.mxu0 %v390_v51  ;;  %496 = vmatpush.msra.mxu2 %v357_v52 }
  0xb5   :  { %516 = vmatpush.msra.mxu3 %v373_v53 }
  0xb6   :  { %536 = vmatpush.msrb.mxu0 %v389_v54  ;;  %497 = vmatpush.msra.mxu2 %v356_v55 }
  0xb7   :  { %517 = vmatpush.msra.mxu3 %v372_v56 }
  0xb8   :  { %537 = vmatpush.msrb.mxu0 %v388_v57  ;;  %498 = vmatpush.msra.mxu2 %v355_v59 }
  0xb9   :  { %277 = vrot.lane.b32.xlu0 %v1374_v40, %s1025_s26  ;;  %v329_v40 = vld [vmem:[%s2070_s2 + $0x180] sm:$0xff]  ;;  %518 = vmatpush.msra.mxu3 %v371_v60 }
  0xba   :  { %488 = vmatpush.msra.mxu1 %v329_v40  ;;  %538 = vmatpush.msrb.mxu0 %v387_v0  ;;  %v377_v40 = vld [vmem:[%s2070_s2 + $0x300] sm:$0xff] }
  0xbb   :  { %499 = vmatpush.msra.mxu2 %v354_v2  ;;  %519 = vmatpush.msra.mxu3 %v370_v3 }
  0xbc   :  { %553 = vmatpush.msrb.mxu1 %v408_v58  ;;  %539 = vmatpush.msrb.mxu0 %v386_v4 }
  0xbd   :  { %500 = vmatpush.msra.mxu2 %v353_v6  ;;  %520 = vmatpush.msra.mxu3 %v369_v7 }
  0xbe   :  { %554 = vmatpush.msrb.mxu1 %v407_v63  ;;  %540 = vmatpush.msrb.mxu0 %v385_v8  ;;  %v988_v63 = vld [vmem:[%s2074_s6] ss:$0 sm:$0xff]  ;;  %s1027_s6 = smov 124  }
  0xbf   :  { %501 = vmatpush.msra.mxu2 %v352_v10  ;;  %521 = vmatpush.msra.mxu3 %v368_v11 }
  0xc0   :  { %555 = vmatpush.msrb.mxu1 %v406_v1  ;;  %541 = vmatpush.msrb.mxu0 %v384_v12 }
  0xc1   :  { %502 = vmatpush.msra.mxu2 %v351_v14  ;;  %522 = vmatpush.msra.mxu3 %v367_v15 }
  0xc2   :  { %556 = vmatpush.msrb.mxu1 %v405_v5  ;;  %542 = vmatpush.msrb.mxu0 %v383_v16  ;;  %v247_v58 = vpop.f32.mrf.mxu1 }
  0xc3   :  { %503 = vmatpush.msra.mxu2 %v350_v17  ;;  %523 = vmatpush.msra.mxu3 %v366_v62  ;;  %v227_v59 = vpop.f32.mrf.mxu0 }
  0xc4   :  { %557 = vmatpush.msrb.mxu1 %v404_v9  ;;  %543 = vmatpush.msrb.mxu0 %v382_v18  ;;  %v1785_v60 = vadd.f32 %v247_v58, %v227_v59  ;;  %v715_v58 = vld [vmem:[%s2071_s3 + $0x100] sm:$0xff]  ;;  %v716_v59 = vld [vmem:[%s2071_s3 + $0x108] sm:$0xff] }
  0xc5   :  { %504 = vmatpush.msra.mxu2 %v349_v19  ;;  %524 = vmatpush.msra.mxu3 %v365_v20 }
  0xc6   :  { %558 = vmatpush.msrb.mxu1 %v403_v13  ;;  %544 = vmatpush.msrb.mxu0 %v381_v21  ;;  %v610_v21 = vld [vmem:[%s2072_s4 + $0x38] sm:$0xff] }
  0xc7   :  { %505 = vmatpush.msra.mxu2 %v348_v23  ;;  %525 = vmatpush.msra.mxu3 %v364_v24  ;;  %v608_v23 = vld [vmem:[%s2072_s4 + $0x28] sm:$0xff]  ;;  %v607_v24 = vld [vmem:[%s2072_s4 + $0x20] sm:$0xff] }
  0xc8   :  { %559 = vmatpush.msrb.mxu1 %v402_v61  ;;  %545 = vmatpush.msrb.mxu0 %v380_v25  ;;  %v606_v25 = vld [vmem:[%s2072_s4 + $0x18] sm:$0xff] }
  0xc9   :  { %506 = vmatpush.msra.mxu2 %v347_v27  ;;  %526 = vmatpush.msra.mxu3 %v363_v28  ;;  %v604_v27 = vld [vmem:[%s2072_s4 + $0x8] sm:$0xff]  ;;  %v603_v28 = vld [vmem:[%s2072_s4] sm:$0xff] }
  0xca   :  { %560 = vmatpush.msrb.mxu1 %v401_v22  ;;  %546 = vmatpush.msrb.mxu0 %v379_v29  ;;  %v609_v22 = vld [vmem:[%s2072_s4 + $0x30] sm:$0xff]  ;;  %v644_v29 = vld [vmem:[%s2073_s5 + $0x38] sm:$0xff] }
  0xcb   :  { %507 = vmatpush.msra.mxu2 %v346_v31  ;;  %527 = vmatpush.msra.mxu3 %v362_v32 }
  0xcc   :  { %561 = vmatpush.msrb.mxu1 %v400_v26  ;;  %547 = vmatpush.msrb.mxu0 %v378_v36  ;;  %v605_v26 = vld [vmem:[%s2072_s4 + $0x10] sm:$0xff]  ;;  %v642_v36 = vld [vmem:[%s2073_s5 + $0x28] sm:$0xff] }
  0xcd   :  { %508 = vmatpush.msra.mxu2 %v345_v38  ;;  %528 = vmatpush.msra.mxu3 %v361_v39  ;;  %v640_v38 = vld [vmem:[%s2073_s5 + $0x18] sm:$0xff]  ;;  %v639_v39 = vld [vmem:[%s2073_s5 + $0x10] sm:$0xff] }
  0xce   :  { %562 = vmatpush.msrb.mxu1 %v399_v30  ;;  %548 = vmatpush.msrb.mxu0 %v377_v40  ;;  %v643_v30 = vld [vmem:[%s2073_s5 + $0x30] sm:$0xff]  ;;  %v638_v40 = vld [vmem:[%s2073_s5 + $0x8] sm:$0xff] }
  0xcf   :  { %622 = vmatpush.msrb.mxu2 %v610_v21  ;;  %v738_v21 = vld [vmem:[%s2071_s3 + $0x1b8] sm:$0xff] }
  0xd0   :  { %563 = vmatpush.msrb.mxu1 %v398_v33 }
  0xd1   :  { %623 = vmatpush.msrb.mxu2 %v609_v22  ;;  %v727_v22 = vld [vmem:[%s2071_s3 + $0x160] sm:$0xff] }
  0xd2   :  { %564 = vmatpush.msrb.mxu1 %v397_v41  ;;  %v637_v41 = vld [vmem:[%s2073_s5] sm:$0xff] }
  0xd3   :  { %624 = vmatpush.msrb.mxu2 %v608_v23  ;;  %v728_v23 = vld [vmem:[%s2071_s3 + $0x168] sm:$0xff] }
  0xd4   :  { %565 = vmatpush.msrb.mxu1 %v396_v42  ;;  %v739_v42 = vld [vmem:[%s2071_s3 + $0x1c0] sm:$0xff] }
  0xd5   :  { %625 = vmatpush.msrb.mxu2 %v607_v24  ;;  %v729_v24 = vld [vmem:[%s2071_s3 + $0x170] sm:$0xff] }
  0xd6   :  { %566 = vmatpush.msrb.mxu1 %v395_v43  ;;  %v740_v43 = vld [vmem:[%s2071_s3 + $0x1c8] sm:$0xff] }
  0xd7   :  { %626 = vmatpush.msrb.mxu2 %v606_v25  ;;  %v730_v25 = vld [vmem:[%s2071_s3 + $0x178] sm:$0xff] }
  0xd8   :  { %567 = vmatpush.msrb.mxu1 %v394_v44  ;;  %v741_v44 = vld [vmem:[%s2071_s3 + $0x1d0] sm:$0xff] }
  0xd9   :  { %627 = vmatpush.msrb.mxu2 %v605_v26  ;;  %v719_v26 = vld [vmem:[%s2071_s3 + $0x120] sm:$0xff] }
  0xda   :  { %568 = vmatpush.msrb.mxu1 %v393_v45  ;;  %v742_v45 = vld [vmem:[%s2071_s3 + $0x1d8] sm:$0xff] }
  0xdb   :  { %628 = vmatpush.msrb.mxu2 %v604_v27  ;;  %v720_v27 = vld [vmem:[%s2071_s3 + $0x128] sm:$0xff] }
  0xdd   :  { %629 = vmatpush.msrb.mxu2 %v603_v28  ;;  %v721_v28 = vld [vmem:[%s2071_s3 + $0x130] sm:$0xff] }
 0x102   :  { %v261_v34 = vpop.permute.xlu2 %260 }
 0x103   :  { %v263_v37 = vmul.f32 %v261_v34, %v1366_v35 }
 0x105   :  { %489 = vmatmul.f32.vlgmr.msra.gmra.mxu1 %v263_v37  ;;  %v641_v37 = vld [vmem:[%s2073_s5 + $0x20] sm:$0xff] }
 0x106   :  { %818 = vmatpush.msra.mxu1 %v742_v45  ;;  %v689_v45 = vld [vmem:[%s2071_s3 + $0x30] sm:$0xff] }
 0x10a   :  { %v274_v50 = vpop.permute.xlu2 %273 }
 0x10b   :  { %v276_v52 = vmul.f32 %v274_v50, %v1366_v35  ;;  %v731_v50 = vld [vmem:[%s2071_s3 + $0x180] sm:$0xff] }
 0x11a   :  { %v257_v46 = vpop.permute.xlu1 %256 }
 0x11b   :  { %v259_v47 = vmul.f32 %v257_v46, %v1366_v35  ;;  %v253_v48 = vpop.permute.xlu0 %252 }
 0x11c   :  { %v255_v49 = vmul.f32 %v253_v48, %v1366_v35 }
 0x11d   :  { %469 = vmatmul.f32.vlgmr.msra.gmra.mxu0 %v259_v47 }
 0x11e   :  { %449 = vmatmul.f32.vlgmr.msrb.gmra.mxu3 %v255_v49  ;;  %798 = vmatpush.msra.mxu0 %v741_v44  ;;  %v688_v44 = vld [vmem:[%s2071_s3 + $0x28] sm:$0xff] }
 0x11f   :  { %656 = vmatpush.msrb.mxu3 %v644_v29  ;;  %v722_v29 = vld [vmem:[%s2071_s3 + $0x138] sm:$0xff] }
 0x121   :  { %657 = vmatpush.msrb.mxu3 %v643_v30  ;;  %v711_v30 = vld [vmem:[%s2071_s3 + $0xe0] sm:$0xff] }
 0x122   :  { %v270_v51 = vpop.permute.xlu1 %269 }
 0x123   :  { %v272_v53 = vmul.f32 %v270_v51, %v1366_v35  ;;  %v265_v54 = vpop.permute.xlu0 %264  ;;  %658 = vmatpush.msrb.mxu3 %v642_v36  ;;  %v732_v51 = vld [vmem:[%s2071_s3 + $0x188] sm:$0xff] }
 0x124   :  { %v268_v55 = vmul.f32 %v265_v54, %v1366_v35  ;;  %v723_v54 = vld [vmem:[%s2071_s3 + $0x140] sm:$0xff]  ;;  %v704_v36 = vld [vmem:[%s2071_s3 + $0xa8] sm:$0xff] }
 0x125   :  { %549 = vmatmul.f32.vlgmr.msrb.gmra.mxu0 %v276_v52  ;;  %659 = vmatpush.msrb.mxu3 %v641_v37  ;;  %v733_v52 = vld [vmem:[%s2071_s3 + $0x190] sm:$0xff] }
 0x126   :  { %509 = vmatmul.f32.vlgmr.msra.gmra.mxu2 %v268_v55  ;;  %529 = vmatmul.f32.vlgmr.msra.gmra.mxu3 %v272_v53  ;;  %v734_v53 = vld [vmem:[%s2071_s3 + $0x198] sm:$0xff]  ;;  %v724_v55 = vld [vmem:[%s2071_s3 + $0x148] sm:$0xff]  ;;  %v705_v37 = vld [vmem:[%s2071_s3 + $0xb0] sm:$0xff] }
 0x127   :  { %660 = vmatpush.msrb.mxu3 %v640_v38  ;;  %758 = vmatpush.msra.mxu2 %v739_v42  ;;  %v706_v38 = vld [vmem:[%s2071_s3 + $0xb8] sm:$0xff] }
 0x128   :  { %799 = vmatpush.msra.mxu0 %v733_v52  ;;  %819 = vmatpush.msra.mxu1 %v734_v53  ;;  %v698_v42 = vld [vmem:[%s2071_s3 + $0x78] sm:$0xff] }
 0x129   :  { %661 = vmatpush.msrb.mxu3 %v639_v39  ;;  %759 = vmatpush.msra.mxu2 %v731_v50  ;;  %v695_v39 = vld [vmem:[%s2071_s3 + $0x60] sm:$0xff] }
 0x12b   :  { %v278_v56 = vpop.permute.xlu0 %277  ;;  %662 = vmatpush.msrb.mxu3 %v638_v40  ;;  %760 = vmatpush.msra.mxu2 %v723_v54  ;;  %v696_v40 = vld [vmem:[%s2071_s3 + $0x68] sm:$0xff] }
 0x12c   :  { %v280_v57 = vmul.f32 %v278_v56, %v1366_v35  ;;  %v725_v56 = vld [vmem:[%s2071_s3 + $0x150] sm:$0xff] }
 0x12d   :  { %v430_v0 = vpop.f32.mrf.mxu2  ;;  %663 = vmatpush.msrb.mxu3 %v637_v41  ;;  %800 = vmatpush.msra.mxu0 %v725_v56  ;;  %v697_v41 = vld [vmem:[%s2071_s3 + $0x70] sm:$0xff] }
 0x12e   :  { %569 = vmatmul.f32.vlgmr.msrb.gmra.mxu1 %v280_v57  ;;  %v431_v1 = vadd.f32 %v988_v63, %v430_v0  ;;  %v726_v57 = vld [vmem:[%s2071_s3 + $0x158] sm:$0xff]  ;;  %v717_v63 = vld [vmem:[%s2071_s3 + $0x110] sm:$0xff]  ;;  %761 = vmatpush.msra.mxu2 %v715_v58 }
 0x12f   :  { %778 = vmatpush.msra.mxu3 %v740_v43  ;;  %820 = vmatpush.msra.mxu1 %v726_v57  ;;  %v718_v0 = vld [vmem:[%s2071_s3 + $0x118] sm:$0xff]  ;;  %v687_v43 = vld [vmem:[%s2071_s3 + $0x20] sm:$0xff] }
 0x130   :  { %801 = vmatpush.msra.mxu0 %v717_v63 }
 0x131   :  { %779 = vmatpush.msra.mxu3 %v732_v51  ;;  %821 = vmatpush.msra.mxu1 %v718_v0 }
 0x133   :  { %780 = vmatpush.msra.mxu3 %v724_v55 }
 0x135   :  { %781 = vmatpush.msra.mxu3 %v716_v59 }
 0x182   :  { %v490_v6 = vpop.f32.mrf.mxu1 }
 0x19a   :  { %v470_v4 = vpop.f32.mrf.mxu0 }
 0x1a1   :  { %v450_v2 = vpop.f32.mrf.mxu3 }
 0x1a2   :  { %v451_v3 = vadd.f32 %v450_v2, %v431_v1  ;;  %v550_v11 = vpop.f32.mrf.mxu0  ;;  %v707_v1 = vld [vmem:[%s2071_s3 + $0xc0] sm:$0xff]  ;;  %v708_v2 = vld [vmem:[%s2071_s3 + $0xc8] sm:$0xff] }
 0x1a3   :  { %762 = vmatpush.msra.mxu2 %v707_v1  ;;  %782 = vmatpush.msra.mxu3 %v708_v2 }
 0x1a4   :  { %v471_v5 = vadd.f32 %v470_v4, %v451_v3  ;;  %v709_v3 = vld [vmem:[%s2071_s3 + $0xd0] sm:$0xff]  ;;  %v710_v4 = vld [vmem:[%s2071_s3 + $0xd8] sm:$0xff] }
 0x1a5   :  { %802 = vmatpush.msra.mxu0 %v709_v3  ;;  %822 = vmatpush.msra.mxu1 %v710_v4 }
 0x1a6   :  { %v491_v7 = vadd.f32 %v490_v6, %v471_v5  ;;  %v699_v5 = vld [vmem:[%s2071_s3 + $0x80] sm:$0xff]  ;;  %v700_v6 = vld [vmem:[%s2071_s3 + $0x88] sm:$0xff] }
 0x1a7   :  { %763 = vmatpush.msra.mxu2 %v699_v5  ;;  %783 = vmatpush.msra.mxu3 %v700_v6 }
 0x1a9   :  { %v510_v8 = vpop.f32.mrf.mxu2  ;;  %v530_v35 = vpop.f32.mrf.mxu3 }
 0x1aa   :  { %v511_v9 = vadd.f32 %v510_v8, %v491_v7  ;;  %v701_v7 = vld [vmem:[%s2071_s3 + $0x90] sm:$0xff]  ;;  %v702_v8 = vld [vmem:[%s2071_s3 + $0x98] sm:$0xff] }
 0x1ab   :  { %v570_v13 = vpop.f32.mrf.mxu1  ;;  %803 = vmatpush.msra.mxu0 %v701_v7  ;;  %823 = vmatpush.msra.mxu1 %v702_v8 }
 0x1ac   :  { %v531_v10 = vadd.f32 %v530_v35, %v511_v9  ;;  %v691_v9 = vld [vmem:[%s2071_s3 + $0x40] sm:$0xff]  ;;  %v692_v35 = vld [vmem:[%s2071_s3 + $0x48] sm:$0xff] }
 0x1ad   :  { %764 = vmatpush.msra.mxu2 %v691_v9  ;;  %784 = vmatpush.msra.mxu3 %v692_v35 }
 0x1ae   :  { %v551_v12 = vadd.f32 %v550_v11, %v531_v10  ;;  %v693_v10 = vld [vmem:[%s2071_s3 + $0x50] sm:$0xff]  ;;  %v694_v11 = vld [vmem:[%s2071_s3 + $0x58] sm:$0xff] }
 0x1af   :  { %804 = vmatpush.msra.mxu0 %v693_v10  ;;  %824 = vmatpush.msra.mxu1 %v694_v11 }
 0x1b0   :  { %v1790_v14 = vadd.f32 %v570_v13, %v551_v12  ;;  %v683_v12 = vld [vmem:[%s2071_s3] sm:$0xff]  ;;  %v684_v13 = vld [vmem:[%s2071_s3 + $0x8] sm:$0xff] }
 0x1b1   :  { %765 = vmatpush.msra.mxu2 %v683_v12  ;;  %785 = vmatpush.msra.mxu3 %v684_v13 }
 0x1b2   :  { %577 = vrot.lane.b32.xlu2 %v1790_v14, %s1026_s8  ;;  %574 = vrot.lane.b32.xlu1 %v1790_v14, %s1027_s6 }
 0x20c   :  { %v578_v15 = vpop.permute.xlu2 %577 }
 0x224   :  { %v575_v16 = vpop.permute.xlu1 %574 }
 0x225   :  { %v581_v61 = vsel %vm580_vm0, %v575_v16, %v578_v15  ;;  %v686_v15 = vld [vmem:[%s2071_s3 + $0x18] sm:$0xff]  ;;  %v743_v16 = vld [vmem:[%s2071_s3 + $0x1e0] sm:$0xff] }
 0x226   :  { %v582_v17 = vmax.f32 %v1790_v14, %v581_v61  ;;  %v744_v61 = vld [vmem:[%s2071_s3 + $0x1e8] sm:$0xff]  ;;  %825 = vmatpush.msra.mxu1 %v686_v15 }
 0x228   :  { %587 = vrot.lane.b32.xlu1 %v582_v17, %s1028_s9  ;;  %584 = vrot.lane.b32.xlu0 %v582_v17, %s1029_s12 }
 0x230   :  { %912 = vrot.lane.b32.xlu1 %v1785_v60, %s1021_s16 }
 0x238   :  { %927 = vrot.lane.b32.xlu1 %v1785_v60, %s1024_s18 }
 0x240   :  { %942 = vrot.lane.b32.xlu1 %v1785_v60, %s1025_s26 }
 0x29a   :  { %v588_v62 = vpop.permute.xlu1 %587  ;;  %v585_v18 = vpop.permute.xlu0 %584 }
 0x29b   :  { %v591_v19 = vsel %vm590_vm1, %v585_v18, %v588_v62  ;;  %v746_v62 = vld [vmem:[%s2071_s3 + $0x1f8] sm:$0xff]  ;;  %v735_v18 = vld [vmem:[%s2071_s3 + $0x1a0] sm:$0xff] }
 0x29c   :  { %v592_v20 = vmax.f32 %v582_v17, %v591_v19  ;;  %v745_v17 = vld [vmem:[%s2071_s3 + $0x1f0] sm:$0xff]  ;;  %v736_v19 = vld [vmem:[%s2071_s3 + $0x1a8] sm:$0xff]  ;;  %898 = vmatpush.msrb.mxu1 %v746_v62 }
 0x29e   :  { %597 = vrot.lane.b32.xlu0 %v592_v20, %s1030_s15  ;;  %594 = vrot.lane.b32.xlu2 %v592_v20, %s1031_s17 }
 0x29f   :  { %899 = vmatpush.msrb.mxu1 %v738_v21 }
 0x2a1   :  { %900 = vmatpush.msrb.mxu1 %v730_v25 }
 0x2a2   :  { %v913_v63 = vpop.permute.xlu1 %912 }
 0x2a3   :  { %901 = vmatpush.msrb.mxu1 %v722_v29 }
 0x2a6   :  { %922 = vrot.lane.b32.xlu0 %v1785_v60, %s1019_s10  ;;  %917 = vrot.lane.b32.xlu2 %v1785_v60, %s1020_s11 }
 0x2aa   :  { %v928_v9 = vpop.permute.xlu1 %927 }
 0x2ae   :  { %937 = vrot.lane.b32.xlu0 %v1785_v60, %s1022_s13  ;;  %932 = vrot.lane.b32.xlu2 %v1785_v60, %s1023_s14 }
 0x2f8   :  { %v595_v31 = vpop.permute.xlu2 %594 }
 0x300   :  { %v918_v0 = vpop.permute.xlu2 %917 }
 0x308   :  { %v933_v15 = vpop.permute.xlu2 %932 }
 0x310   :  { %v598_v32 = vpop.permute.xlu0 %597 }
 0x311   :  { %v601_v33 = vsel %vm600_vm2, %v595_v31, %v598_v32  ;;  %v712_v31 = vld [vmem:[%s2071_s3 + $0xe8] sm:$0xff]  ;;  %v713_v32 = vld [vmem:[%s2071_s3 + $0xf0] sm:$0xff] }
 0x312   :  { %v602_v34 = vmax.f32 %v592_v20, %v601_v33  ;;  %v737_v20 = vld [vmem:[%s2071_s3 + $0x1b0] sm:$0xff]  ;;  %v714_v33 = vld [vmem:[%s2071_s3 + $0xf8] sm:$0xff] }
 0x313   :  { %902 = vmatpush.msrb.mxu1 %v714_v33 }
 0x314   :  { %964 = vmatmul.msk.f32.vlgmr.msrb.gmra.mxu2 %vm267_vm3, %v602_v34  ;;  %v703_v34 = vld [vmem:[%s2071_s3 + $0xa0] sm:$0xff] }
 0x315   :  { %838 = vmatpush.msrb.mxu2 %v743_v16  ;;  %903 = vmatpush.msrb.mxu1 %v706_v38 }
 0x317   :  { %839 = vmatpush.msrb.mxu2 %v735_v18  ;;  %904 = vmatpush.msrb.mxu1 %v698_v42 }
 0x318   :  { %v923_v5 = vpop.permute.xlu0 %922 }
 0x319   :  { %840 = vmatpush.msrb.mxu2 %v727_v22 }
 0x31b   :  { %841 = vmatpush.msrb.mxu2 %v719_v26 }
 0x31d   :  { %842 = vmatpush.msrb.mxu2 %v711_v30 }
 0x31f   :  { %843 = vmatpush.msrb.mxu2 %v703_v34 }
 0x320   :  { %v938_v62 = vpop.permute.xlu0 %937 }
 0x321   :  { %844 = vmatpush.msrb.mxu2 %v695_v39 }
 0x323   :  { %845 = vmatpush.msrb.mxu2 %v687_v43 }
 0x397   :  { %v631_v46 = vpop.f32.mrf.mxu2 }
 0x398   :  { %v634_v47 = vsub.f32 %v1790_v14, %v631_v46  ;;  %v685_v14 = vld [vmem:[%s2071_s3 + $0x10] sm:$0xff]  ;;  %v690_v46 = vld [vmem:[%s2071_s3 + $0x38] sm:$0xff]  ;;  %s1032_s3 = smov [#allocation2]  }
 0x399   :  { %805 = vmatpush.msra.mxu0 %v685_v14  ;;  %905 = vmatpush.msrb.mxu1 %v690_v46  ;;  %s953_s27 = sshll.u32 %s1032_s3, 4  ;;  %s954_s27 = int_to_ptr.vmem [resolvable:$true] %s953_s27 }
 0x39a   :  { %v635_v48 = vmul.f32 1.442695, %v634_v47 }
 0x39b   :  { %878 = vmatpush.msrb.mxu0 %v745_v17 }
 0x39c   :  { %989 = vpow2.f32 %v635_v48 }
 0x39d   :  { %879 = vmatpush.msrb.mxu0 %v737_v20  ;;  %v943_v20 = vpop.permute.xlu1 %942 }
 0x39f   :  { %880 = vmatpush.msrb.mxu0 %v729_v24 }
 0x3a1   :  { %881 = vmatpush.msrb.mxu0 %v721_v28 }
 0x3a2   :  { %v1871_v49 = vpop.eup %989 }
 0x3a3   :  { %965 = vmatmul.msk.f32.vlgmr.msrb.gmra.mxu3 %vm267_vm3, %v1871_v49  ;;  %882 = vmatpush.msrb.mxu0 %v713_v32 }
 0x3a4   :  { %858 = vmatpush.msrb.mxu3 %v744_v61 }
 0x3a5   :  { %883 = vmatpush.msrb.mxu0 %v705_v37 }
 0x3a6   :  { %859 = vmatpush.msrb.mxu3 %v736_v19 }
 0x3a7   :  { %884 = vmatpush.msrb.mxu0 %v697_v41 }
 0x3a8   :  { %860 = vmatpush.msrb.mxu3 %v728_v23 }
 0x3a9   :  { %885 = vmatpush.msrb.mxu0 %v689_v45 }
 0x3aa   :  { %861 = vmatpush.msrb.mxu3 %v720_v27 }
 0x3ac   :  { %862 = vmatpush.msrb.mxu3 %v712_v31 }
 0x3ae   :  { %863 = vmatpush.msrb.mxu3 %v704_v36 }
 0x3b0   :  { %864 = vmatpush.msrb.mxu3 %v696_v40 }
 0x3b2   :  { %865 = vmatpush.msrb.mxu3 %v688_v44 }
 0x426   :  { %v665_v47 = vpop.f32.mrf.mxu3 }
 0x427   :  { %991 = vrcp.f32 %v665_v47  ;;  %v679_v52 = vand.u32 2147483648, %v665_v47  ;;  %v677_v54 = vand.u32 2147483647, %v665_v47  ;;  %vm673_vm5 = vweird.f32 %v665_v47 }
 0x429   :  { %v680_v56 = vor.u32 1.1754944e-38, %v679_v52  ;;  %vm678_vm7 = vcmp.eq.f32.partialorder %v677_v54, 8.507059e+37 }
 0x42d   :  { %v992_v48 = vpop.eup %991 }
 0x42e   :  { %v669_v50 = vmul.f32 %v992_v48, %v665_v47  ;;  %vm674_vm4 = vweird.f32 %v992_v48 }
 0x42f   :  { %vm675_vm6 = vmor %vm673_vm5, %vm674_vm4 }
 0x430   :  { %v670_v51 = vsub.f32 1.0, %v669_v50 }
 0x432   :  { %v671_v53 = vmul.f32 %v992_v48, %v670_v51 }
 0x434   :  { %v672_v55 = vadd.f32 %v992_v48, %v671_v53 }
 0x436   :  { %v676_v57 = vsel %vm675_vm6, %v992_v48, %v672_v55 }
 0x437   :  { %v681_v58 = vsel %vm678_vm7, %v680_v56, %v676_v57 }
 0x438   :  { %v682_v59 = vmul.f32 %v1871_v49, %v681_v58 }
 0x43a   :  { %966 = vmatmul.msk.f32.vlgmr.msra.gmra.mxu2 %vm267_vm3, %v682_v59  ;;  %967 = vmatmul.msk.f32.vlgmr.msra.gmra.mxu3 %vm267_vm3, %v682_v59 }
 0x43b   :  { %968 = vmatmul.msk.f32.vlgmr.msra.gmra.mxu0 %vm267_vm3, %v682_v59  ;;  %969 = vmatmul.msk.f32.vlgmr.msra.gmra.mxu1 %vm267_vm3, %v682_v59 }
 0x442   :  { %970 = vmatmul.msk.f32.vlgmr.msrb.gmra.mxu2 %vm267_vm3, %v682_v59  ;;  %971 = vmatmul.msk.f32.vlgmr.msrb.gmra.mxu3 %vm267_vm3, %v682_v59 }
 0x443   :  { %972 = vmatmul.msk.f32.vlgmr.msrb.gmra.mxu0 %vm267_vm3, %v682_v59  ;;  %973 = vmatmul.msk.f32.vlgmr.msrb.gmra.mxu1 %vm267_vm3, %v682_v59 }
 0x4b8   :  { %v807_v1 = vpop.f32.mrf.mxu0  ;;  %v827_v6 = vpop.f32.mrf.mxu1 }
 0x4b9   :  { %v920_v7 = vmul.f32 %v918_v0, %v807_v1  ;;  %v925_v10 = vmul.f32 %v923_v5, %v827_v6 }
 0x4bd   :  { %v767_v49 = vpop.f32.mrf.mxu2  ;;  %v787_v2 = vpop.f32.mrf.mxu3 }
 0x4be   :  { %v910_v3 = vmul.f32 %v767_v49, %v1785_v60  ;;  %v915_v4 = vmul.f32 %v913_v63, %v787_v2 }
 0x4c0   :  { %v916_v8 = vadd.f32 %v915_v4, %v910_v3  ;;  %v887_v16 = vpop.f32.mrf.mxu0  ;;  %v907_v18 = vpop.f32.mrf.mxu1 }
 0x4c1   :  { %v940_v19 = vmul.f32 %v938_v62, %v887_v16  ;;  %v945_v21 = vmul.f32 %v943_v20, %v907_v18 }
 0x4c2   :  { %v921_v35 = vadd.f32 %v920_v7, %v916_v8 }
 0x4c4   :  { %v926_v13 = vadd.f32 %v925_v10, %v921_v35 }
 0x4c5   :  { %v847_v11 = vpop.f32.mrf.mxu2  ;;  %v867_v12 = vpop.f32.mrf.mxu3 }
 0x4c6   :  { %v930_v14 = vmul.f32 %v928_v9, %v847_v11  ;;  %v935_v17 = vmul.f32 %v933_v15, %v867_v12 }
 0x4c8   :  { %v931_v61 = vadd.f32 %v930_v14, %v926_v13 }
 0x4ca   :  { %v936_v60 = vadd.f32 %v935_v17, %v931_v61 }
 0x4cc   :  { %v941_v22 = vadd.f32 %v940_v19, %v936_v60 }
 0x4ce   :  { %v946_v23 = vadd.f32 %v945_v21, %v941_v22 }
 0x4d0   :  { %947 = vst [vmem:[#allocation2] sm:$0x3] %v946_v23 }
 0x4d1   :  { %958 = dma.vmem_to_hbm [thread:$0]  %s954_s27, 32, %s956_s30, [#allocation3]  }
 0x4d2   :  { %1017 = dma.done.wait [#allocation3], 32  }
 0x4d3   :  { %1018 = vsyncadd [#allocation3], 4294967264 }
 0x4d4   :  { %963 = vsyncpa [#allocation3], 1 }

</bundles_post_ra>
